<compile_context>
chip_gen: v6e
topology: v6e:2x2x1
jax: 0.10.0
libtpu: 0.0.40
codegen_flags: <defaults>
</compile_context>

<pallas_src>
import jax
import jax.numpy as jnp
from jax import lax
from jax.experimental import pallas as pl
from jax.experimental.pallas import tpu as pltpu


def _round_up(x, m):
    return (x + m - 1) // m * m


# ----------------------------------------------------------------------------
# Fused CNN kernel
# ----------------------------------------------------------------------------
def _make_fused_cnn_kernel(acts, *, B, H, W, K, Cin_raw, C_pad, Lseg, Mpad):
    """acts: tuple of activation names per conv layer ('leaky_relu' | 'relu' | 'none')."""
    p = K // 2
    Hp, Wp = H + 2 * p, W + 2 * p
    L = Hp * Wp                  # flat padded-frame size
    BL = B * Lseg                # packed lane width (multiple of 128)
    n_layers = len(acts)

    def kernel(*refs):
        x_ref, mask_ref = refs[0], refs[1]
        o_ref, x_scr = refs[-2], refs[-1]
        wb = refs[2:-2]

        # Margins / padding rings / tails must read as zero -> re-zero scratch each step
        # (also keeps grid iterations fully independent for "parallel" semantics).
        x_scr[...] = jnp.zeros_like(x_scr)

        # In-kernel "SAME" padding: place each image's unpadded rows into the interior
        # of its own padded frame; ring + inter-image margins stay zero.
        # TODO(synk): for very large H, switch this static unrolled loop to pl.loop.
        for b in range(B):
            base = b * Lseg + Mpad + p * Wp + p
            for h in range(H):
                x_scr[0:Cin_raw, base + h * Wp: base + h * Wp + W] = (
                    x_ref[b, :, h * W: h * W + W].astype(jnp.float32))

        mask = mask_ref[...]                     # (1, BL): 1 on frame interiors, else 0

        for li, act in enumerate(acts):
            w_ref = wb[2 * li]                   # (K*K, C_pad, C_pad); w_ref[t] = W[kh,kw].T padded
            b_ref = wb[2 * li + 1]               # (C_pad, 1)

            # Accumulated per-tap matmuls (no patches buffer, no concatenations).
            acc = None
            for kh in range(K):
                for kw in range(K):
                    t = kh * K + kw
                    s = Mpad + (kh - p) * Wp + (kw - p)      # static offset, >= 0
                    tap = x_scr[:, s: s + BL]                # (C_pad, BL)
                    d = jnp.dot(w_ref[t], tap, preferred_element_type=jnp.float32)
                    acc = d if acc is None else acc + d
            acc = acc + b_ref[...]

            if act == "leaky_relu":              # PyTorch nn.LeakyReLU default slope 0.01
                acc = jnp.where(acc > 0, acc, 0.01 * acc)
            elif act == "relu":
                acc = jnp.maximum(acc, 0.0)

            if li < n_layers - 1:
                # Re-zero ring/margins and store for the next layer.
                # Mpad and BL are multiples of 128 -> aligned, unmasked, lane-dense store.
                x_scr[:, Mpad: Mpad + BL] = acc * mask
            else:
                o_ref[0] = acc.astype(o_ref.dtype)           # (C_pad, BL), lane-dense

    return kernel


# ----------------------------------------------------------------------------
# CNNNet in JAX
# ----------------------------------------------------------------------------
def concat_input(in_type, patch_image, patch_grid):
    if in_type == "rgb":
        return patch_image
    elif in_type == "xy":
        return patch_grid
    elif in_type == "rgbxy":
        return jnp.concatenate(
            (patch_image, patch_grid.astype(patch_image.dtype)), axis=1
        )
    else:
        raise ValueError(f"in_type must be one of: rgb, xy, rgbxy but was: {in_type}")


def init_cnn_params(key, in_chn, out_chn, kernel_size, width, depth):
    """Deterministic synthetic params. Weight layout stored as (K, K, Cin, Cout)."""
    params = []
    dims = [(in_chn, width)] + [(width, width)] * depth + [(width, out_chn)]
    for (cin, cout) in dims:
        key, kw, kb = jax.random.split(key, 3)
        fan_in = cin * kernel_size * kernel_size
        bound = 1.0 / (fan_in ** 0.5)
        w = jax.random.uniform(
            kw, (kernel_size, kernel_size, cin, cout), jnp.float32, -bound, bound
        )
        b = jax.random.uniform(kb, (cout,), jnp.float32, -bound, bound)
        params.append((w, b))
    return params


def _choose_grouping(N, Lseg):
    """Images per grid step (B) and grid length (G).

    Keep >= 2 grid steps when possible so ("parallel",) shards across both v7x
    TensorCores; cap packed lane width to bound accumulator vreg pressure.
    On single-TC v5e/v6e this still collapses the batch into few steps.
    """
    if N <= 1:
        return 1, max(N, 1)
    max_lanes = 4096
    b_cap = max(1, max_lanes // Lseg)
    G = min(N, max(2, -(-N // b_cap)))
    B = -(-N // G)
    G = -(-N // B)
    return B, G


def cnn_net_forward(params, image_nchw, grid_nchw, in_type="rgbxy"):
    # TODO(synk): @batcherize(keep=True) decorator not reproduced; inputs assumed batched NCHW.
    x = concat_input(in_type, image_nchw, grid_nchw).astype(jnp.float32)  # (N, Cin, H, W)
    N, Cin, H, W = x.shape
    K = params[0][0].shape[0]
    p = K // 2
    Hp, Wp = H + 2 * p, W + 2 * p
    L = Hp * Wp
    M = p * Wp + p                               # max tap shift magnitude
    Mpad = _round_up(max(M, 1), 128)             # 128-aligned head margin
    Lseg = _round_up(L + M, 128)                 # per-image segment (multiple of 128)

    out_chn = params[-1][0].shape[3]
    chans = [Cin] + [w.shape[3] for (w, _) in params]
    C_pad = _round_up(max(chans), 8)             # full-sublane channel padding

    B, G = _choose_grouping(N, Lseg)
    BL = B * Lseg
    W_scr = BL + 2 * Mpad                        # scratch width (multiple of 128)
    Npad = B * G

    # Only a free trailing-dim reshape on the input; all padding happens in-kernel.
    xin = x.reshape(N, Cin, H * W)
    if Npad != N:
        xin = jnp.pad(xin, ((0, Npad - N), (0, 0), (0, 0)))

    # Interior mask over the packed lane axis (1 inside each HxW interior, 0 elsewhere).
    j = jnp.arange(BL)
    i = j % Lseg
    r = i // Wp
    c = i % Wp
    interior = (i < L) & (r >= p) & (r < p + H) & (c >= p) & (c < p + W)
    mask = interior.astype(jnp.float32).reshape(1, BL)

    acts = ["leaky_relu"] + ["relu"] * (len(params) - 2) + ["none"]

    flat_inputs = [xin, mask]
    in_specs = [
        pl.BlockSpec((B, Cin, H * W), lambda g: (g, 0, 0)),
        pl.BlockSpec((1, BL), lambda g: (0, 0)),
    ]
    for (w, b) in params:
        kk, _, cin, cout = w.shape
        # Per-tap weights (K*K, C_pad, C_pad), w[t] = W[kh,kw].T, zero-padded channels.
        wt = jnp.transpose(w.astype(jnp.float32), (0, 1, 3, 2)).reshape(kk * kk, cout, cin)
        wt = jnp.pad(wt, ((0, 0), (0, C_pad - cout), (0, C_pad - cin)))
        bt = jnp.pad(b.astype(jnp.float32).reshape(cout, 1), ((0, C_pad - cout), (0, 0)))
        flat_inputs += [wt, bt]
        in_specs += [
            pl.BlockSpec((kk * kk, C_pad, C_pad), lambda g: (0, 0, 0)),
            pl.BlockSpec((C_pad, 1), lambda g: (0, 0)),
        ]

    kernel = _make_fused_cnn_kernel(
        tuple(acts), B=B, H=H, W=W, K=K, Cin_raw=Cin, C_pad=C_pad,
        Lseg=Lseg, Mpad=Mpad)

    # TODO(synk): for very large H*W, tile the spatial (lane) axis with a halo and set
    # pltpu.CompilerParams(vmem_limit_bytes=...) — re-derive per chip (64 MiB on v7x).
    out = pl.pallas_call(
        kernel,
        out_shape=jax.ShapeDtypeStruct((G, C_pad, BL), jnp.float32),
        grid=(G,),
        in_specs=in_specs,
        out_specs=pl.BlockSpec((1, C_pad, BL), lambda g: (g, 0, 0)),
        scratch_shapes=[pltpu.VMEM((C_pad, W_scr), jnp.float32)],
        compiler_params=pltpu.CompilerParams(dimension_semantics=("parallel",)),
    )(*flat_inputs)

    # Unpack (G, C_pad, B*Lseg) -> (N, out_chn, H, W).
    out = out.reshape(G, C_pad, B, Lseg)[..., :L].reshape(G, C_pad, B, Hp, Wp)
    out = out[..., p:p + H, p:p + W]
    out = jnp.transpose(out, (0, 2, 1, 3, 4)).reshape(Npad, C_pad, H, W)
    return out[:N, :out_chn]


# ----------------------------------------------------------------------------
# Pure-JAX reference (same math, XLA conv) for a correctness cross-check.
# ----------------------------------------------------------------------------
def _reference_forward(params, image, grid, in_type):
    x = concat_input(in_type, image, grid).astype(jnp.float32)
    acts = ["leaky_relu"] + ["relu"] * (len(params) - 2) + ["none"]
    for (w, b), act in zip(params, acts):
        x = lax.conv_general_dilated(
            x, w.astype(jnp.float32), window_strides=(1, 1), padding="SAME",
            dimension_numbers=("NCHW", "HWIO", "NCHW"),
        ) + b.reshape(1, -1, 1, 1)
        if act == "leaky_relu":
            x = jnp.where(x > 0, x, 0.01 * x)
        elif act == "relu":
            x = jnp.maximum(x, 0.0)
    return x


if __name__ == "__main__":
    # in_type='rgbxy' -> in_chn = 3 (rgb) + 2 (xy) = 5
    N, H, W = 2, 16, 16
    rgb_chn, xy_chn = 3, 2
    in_chn, out_chn = rgb_chn + xy_chn, 3
    kernel_size, width, depth = 3, 8, 2

    key = jax.random.PRNGKey(0)
    k_img, k_grid, k_par = jax.random.split(key, 3)
    image = jax.random.normal(k_img, (N, rgb_chn, H, W), jnp.float32)
    grid = jax.random.normal(k_grid, (N, xy_chn, H, W), jnp.float32)

    params = init_cnn_params(k_par, in_chn, out_chn, kernel_size, width, depth)

    out = cnn_net_forward(params, image, grid, in_type="rgbxy")
    out = jax.block_until_ready(out)
    assert out.shape == (N, out_chn, H, W)

    ref = _reference_forward(params, image, grid, "rgbxy")
    err = float(jnp.max(jnp.abs(out - ref)))
    assert jnp.allclose(out, ref, atol=1e-4, rtol=1e-4), f"max abs err {err}"

    print("KERNEL_OK")
</pallas_src>

<mosaic_0001>
module attributes {stable_mosaic.version = 11 : i64} {
  func.func @kernel(%arg0: i32, %arg1: memref<1x5x256xf32, #tpu.memory_space<vmem>>, %arg2: memref<1x384xf32, #tpu.memory_space<vmem>>, %arg3: memref<9x8x8xf32, #tpu.memory_space<vmem>>, %arg4: memref<8x1xf32, #tpu.memory_space<vmem>>, %arg5: memref<9x8x8xf32, #tpu.memory_space<vmem>>, %arg6: memref<8x1xf32, #tpu.memory_space<vmem>>, %arg7: memref<9x8x8xf32, #tpu.memory_space<vmem>>, %arg8: memref<8x1xf32, #tpu.memory_space<vmem>>, %arg9: memref<9x8x8xf32, #tpu.memory_space<vmem>>, %arg10: memref<8x1xf32, #tpu.memory_space<vmem>>, %arg11: memref<1x8x384xf32, #tpu.memory_space<vmem>>, %arg12: memref<8x640xf32, #tpu.memory_space<vmem>>) attributes {dimension_semantics = [#tpu.dimension_semantics<parallel>], iteration_bounds = array<i64: 2>, scalar_prefetch = 0 : i64, scratch_operands = 1 : i64, tpu.core_type = #tpu.core_type<tc>, window_params = [{transform_indices = @transform_0, window_bounds = array<i64: 1, 5, 256>}, {pipeline_mode = #tpu.pipeline_mode<synchronous>, transform_indices = @transform_1, window_bounds = array<i64: 1, 384>}, {pipeline_mode = #tpu.pipeline_mode<synchronous>, transform_indices = @transform_2, window_bounds = array<i64: 9, 8, 8>}, {pipeline_mode = #tpu.pipeline_mode<synchronous>, transform_indices = @transform_3, window_bounds = array<i64: 8, 1>}, {pipeline_mode = #tpu.pipeline_mode<synchronous>, transform_indices = @transform_4, window_bounds = array<i64: 9, 8, 8>}, {pipeline_mode = #tpu.pipeline_mode<synchronous>, transform_indices = @transform_5, window_bounds = array<i64: 8, 1>}, {pipeline_mode = #tpu.pipeline_mode<synchronous>, transform_indices = @transform_6, window_bounds = array<i64: 9, 8, 8>}, {pipeline_mode = #tpu.pipeline_mode<synchronous>, transform_indices = @transform_7, window_bounds = array<i64: 8, 1>}, {pipeline_mode = #tpu.pipeline_mode<synchronous>, transform_indices = @transform_8, window_bounds = array<i64: 9, 8, 8>}, {pipeline_mode = #tpu.pipeline_mode<synchronous>, transform_indices = @transform_9, window_bounds = array<i64: 8, 1>}, {transform_indices = @transform_10, window_bounds = array<i64: 1, 8, 384>}]} {
    %cst = arith.constant 0.000000e+00 : f32
    %0 = vector.broadcast %cst : f32 to vector<8x640xf32>
    %c0 = arith.constant 0 : index
    %c0_0 = arith.constant 0 : index
    %1 = vector.load %arg12[%c0, %c0_0] : memref<8x640xf32, #tpu.memory_space<vmem>>, vector<8x640xf32>
    tpu.vector_store %arg12[%c0, %c0_0], %0 {strides = array<i32>} : memref<8x640xf32, #tpu.memory_space<vmem>>, vector<8x640xf32>,
    %c0_1 = arith.constant 0 : index
    %c0_2 = arith.constant 0 : index
    %c0_3 = arith.constant 0 : index
    %2 = vector.load %arg1[%c0_1, %c0_2, %c0_3] : memref<1x5x256xf32, #tpu.memory_space<vmem>>, vector<1x5x16xf32>
    %3 = vector.shape_cast %2 : vector<1x5x16xf32> to vector<5x16xf32>
    %c0_4 = arith.constant 0 : index
    %c147 = arith.constant 147 : index
    %4 = vector.load %arg12[%c0_4, %c147] : memref<8x640xf32, #tpu.memory_space<vmem>>, vector<5x16xf32>
    tpu.vector_store %arg12[%c0_4, %c147], %3 {strides = array<i32>} : memref<8x640xf32, #tpu.memory_space<vmem>>, vector<5x16xf32>,
    %c0_5 = arith.constant 0 : index
    %c0_6 = arith.constant 0 : index
    %c16 = arith.constant 16 : index
    %5 = vector.load %arg1[%c0_5, %c0_6, %c16] : memref<1x5x256xf32, #tpu.memory_space<vmem>>, vector<1x5x16xf32>
    %6 = vector.shape_cast %5 : vector<1x5x16xf32> to vector<5x16xf32>
    %c0_7 = arith.constant 0 : index
    %c165 = arith.constant 165 : index
    %7 = vector.load %arg12[%c0_7, %c165] : memref<8x640xf32, #tpu.memory_space<vmem>>, vector<5x16xf32>
    tpu.vector_store %arg12[%c0_7, %c165], %6 {strides = array<i32>} : memref<8x640xf32, #tpu.memory_space<vmem>>, vector<5x16xf32>,
    %c0_8 = arith.constant 0 : index
    %c0_9 = arith.constant 0 : index
    %c32 = arith.constant 32 : index
    %8 = vector.load %arg1[%c0_8, %c0_9, %c32] : memref<1x5x256xf32, #tpu.memory_space<vmem>>, vector<1x5x16xf32>
    %9 = vector.shape_cast %8 : vector<1x5x16xf32> to vector<5x16xf32>
    %c0_10 = arith.constant 0 : index
    %c183 = arith.constant 183 : index
    %10 = vector.load %arg12[%c0_10, %c183] : memref<8x640xf32, #tpu.memory_space<vmem>>, vector<5x16xf32>
    tpu.vector_store %arg12[%c0_10, %c183], %9 {strides = array<i32>} : memref<8x640xf32, #tpu.memory_space<vmem>>, vector<5x16xf32>,
    %c0_11 = arith.constant 0 : index
    %c0_12 = arith.constant 0 : index
    %c48 = arith.constant 48 : index
    %11 = vector.load %arg1[%c0_11, %c0_12, %c48] : memref<1x5x256xf32, #tpu.memory_space<vmem>>, vector<1x5x16xf32>
    %12 = vector.shape_cast %11 : vector<1x5x16xf32> to vector<5x16xf32>
    %c0_13 = arith.constant 0 : index
    %c201 = arith.constant 201 : index
    %13 = vector.load %arg12[%c0_13, %c201] : memref<8x640xf32, #tpu.memory_space<vmem>>, vector<5x16xf32>
    tpu.vector_store %arg12[%c0_13, %c201], %12 {strides = array<i32>} : memref<8x640xf32, #tpu.memory_space<vmem>>, vector<5x16xf32>,
    %c0_14 = arith.constant 0 : index
    %c0_15 = arith.constant 0 : index
    %c64 = arith.constant 64 : index
    %14 = vector.load %arg1[%c0_14, %c0_15, %c64] : memref<1x5x256xf32, #tpu.memory_space<vmem>>, vector<1x5x16xf32>
    %15 = vector.shape_cast %14 : vector<1x5x16xf32> to vector<5x16xf32>
    %c0_16 = arith.constant 0 : index
    %c219 = arith.constant 219 : index
    %16 = vector.load %arg12[%c0_16, %c219] : memref<8x640xf32, #tpu.memory_space<vmem>>, vector<5x16xf32>
    tpu.vector_store %arg12[%c0_16, %c219], %15 {strides = array<i32>} : memref<8x640xf32, #tpu.memory_space<vmem>>, vector<5x16xf32>,
    %c0_17 = arith.constant 0 : index
    %c0_18 = arith.constant 0 : index
    %c80 = arith.constant 80 : index
    %17 = vector.load %arg1[%c0_17, %c0_18, %c80] : memref<1x5x256xf32, #tpu.memory_space<vmem>>, vector<1x5x16xf32>
    %18 = vector.shape_cast %17 : vector<1x5x16xf32> to vector<5x16xf32>
    %c0_19 = arith.constant 0 : index
    %c237 = arith.constant 237 : index
    %19 = vector.load %arg12[%c0_19, %c237] : memref<8x640xf32, #tpu.memory_space<vmem>>, vector<5x16xf32>
    tpu.vector_store %arg12[%c0_19, %c237], %18 {strides = array<i32>} : memref<8x640xf32, #tpu.memory_space<vmem>>, vector<5x16xf32>,
    %c0_20 = arith.constant 0 : index
    %c0_21 = arith.constant 0 : index
    %c96 = arith.constant 96 : index
    %20 = vector.load %arg1[%c0_20, %c0_21, %c96] : memref<1x5x256xf32, #tpu.memory_space<vmem>>, vector<1x5x16xf32>
    %21 = vector.shape_cast %20 : vector<1x5x16xf32> to vector<5x16xf32>
    %c0_22 = arith.constant 0 : index
    %c255 = arith.constant 255 : index
    %22 = vector.load %arg12[%c0_22, %c255] : memref<8x640xf32, #tpu.memory_space<vmem>>, vector<5x16xf32>
    tpu.vector_store %arg12[%c0_22, %c255], %21 {strides = array<i32>} : memref<8x640xf32, #tpu.memory_space<vmem>>, vector<5x16xf32>,
    %c0_23 = arith.constant 0 : index
    %c0_24 = arith.constant 0 : index
    %c112 = arith.constant 112 : index
    %23 = vector.load %arg1[%c0_23, %c0_24, %c112] : memref<1x5x256xf32, #tpu.memory_space<vmem>>, vector<1x5x16xf32>
    %24 = vector.shape_cast %23 : vector<1x5x16xf32> to vector<5x16xf32>
    %c0_25 = arith.constant 0 : index
    %c273 = arith.constant 273 : index
    %25 = vector.load %arg12[%c0_25, %c273] : memref<8x640xf32, #tpu.memory_space<vmem>>, vector<5x16xf32>
    tpu.vector_store %arg12[%c0_25, %c273], %24 {strides = array<i32>} : memref<8x640xf32, #tpu.memory_space<vmem>>, vector<5x16xf32>,
    %c0_26 = arith.constant 0 : index
    %c0_27 = arith.constant 0 : index
    %c128 = arith.constant 128 : index
    %26 = vector.load %arg1[%c0_26, %c0_27, %c128] : memref<1x5x256xf32, #tpu.memory_space<vmem>>, vector<1x5x16xf32>
    %27 = vector.shape_cast %26 : vector<1x5x16xf32> to vector<5x16xf32>
    %c0_28 = arith.constant 0 : index
    %c291 = arith.constant 291 : index
    %28 = vector.load %arg12[%c0_28, %c291] : memref<8x640xf32, #tpu.memory_space<vmem>>, vector<5x16xf32>
    tpu.vector_store %arg12[%c0_28, %c291], %27 {strides = array<i32>} : memref<8x640xf32, #tpu.memory_space<vmem>>, vector<5x16xf32>,
    %c0_29 = arith.constant 0 : index
    %c0_30 = arith.constant 0 : index
    %c144 = arith.constant 144 : index
    %29 = vector.load %arg1[%c0_29, %c0_30, %c144] : memref<1x5x256xf32, #tpu.memory_space<vmem>>, vector<1x5x16xf32>
    %30 = vector.shape_cast %29 : vector<1x5x16xf32> to vector<5x16xf32>
    %c0_31 = arith.constant 0 : index
    %c309 = arith.constant 309 : index
    %31 = vector.load %arg12[%c0_31, %c309] : memref<8x640xf32, #tpu.memory_space<vmem>>, vector<5x16xf32>
    tpu.vector_store %arg12[%c0_31, %c309], %30 {strides = array<i32>} : memref<8x640xf32, #tpu.memory_space<vmem>>, vector<5x16xf32>,
    %c0_32 = arith.constant 0 : index
    %c0_33 = arith.constant 0 : index
    %c160 = arith.constant 160 : index
    %32 = vector.load %arg1[%c0_32, %c0_33, %c160] : memref<1x5x256xf32, #tpu.memory_space<vmem>>, vector<1x5x16xf32>
    %33 = vector.shape_cast %32 : vector<1x5x16xf32> to vector<5x16xf32>
    %c0_34 = arith.constant 0 : index
    %c327 = arith.constant 327 : index
    %34 = vector.load %arg12[%c0_34, %c327] : memref<8x640xf32, #tpu.memory_space<vmem>>, vector<5x16xf32>
    tpu.vector_store %arg12[%c0_34, %c327], %33 {strides = array<i32>} : memref<8x640xf32, #tpu.memory_space<vmem>>, vector<5x16xf32>,
    %c0_35 = arith.constant 0 : index
    %c0_36 = arith.constant 0 : index
    %c176 = arith.constant 176 : index
    %35 = vector.load %arg1[%c0_35, %c0_36, %c176] : memref<1x5x256xf32, #tpu.memory_space<vmem>>, vector<1x5x16xf32>
    %36 = vector.shape_cast %35 : vector<1x5x16xf32> to vector<5x16xf32>
    %c0_37 = arith.constant 0 : index
    %c345 = arith.constant 345 : index
    %37 = vector.load %arg12[%c0_37, %c345] : memref<8x640xf32, #tpu.memory_space<vmem>>, vector<5x16xf32>
    tpu.vector_store %arg12[%c0_37, %c345], %36 {strides = array<i32>} : memref<8x640xf32, #tpu.memory_space<vmem>>, vector<5x16xf32>,
    %c0_38 = arith.constant 0 : index
    %c0_39 = arith.constant 0 : index
    %c192 = arith.constant 192 : index
    %38 = vector.load %arg1[%c0_38, %c0_39, %c192] : memref<1x5x256xf32, #tpu.memory_space<vmem>>, vector<1x5x16xf32>
    %39 = vector.shape_cast %38 : vector<1x5x16xf32> to vector<5x16xf32>
    %c0_40 = arith.constant 0 : index
    %c363 = arith.constant 363 : index
    %40 = vector.load %arg12[%c0_40, %c363] : memref<8x640xf32, #tpu.memory_space<vmem>>, vector<5x16xf32>
    tpu.vector_store %arg12[%c0_40, %c363], %39 {strides = array<i32>} : memref<8x640xf32, #tpu.memory_space<vmem>>, vector<5x16xf32>,
    %c0_41 = arith.constant 0 : index
    %c0_42 = arith.constant 0 : index
    %c208 = arith.constant 208 : index
    %41 = vector.load %arg1[%c0_41, %c0_42, %c208] : memref<1x5x256xf32, #tpu.memory_space<vmem>>, vector<1x5x16xf32>
    %42 = vector.shape_cast %41 : vector<1x5x16xf32> to vector<5x16xf32>
    %c0_43 = arith.constant 0 : index
    %c381 = arith.constant 381 : index
    %43 = vector.load %arg12[%c0_43, %c381] : memref<8x640xf32, #tpu.memory_space<vmem>>, vector<5x16xf32>
    tpu.vector_store %arg12[%c0_43, %c381], %42 {strides = array<i32>} : memref<8x640xf32, #tpu.memory_space<vmem>>, vector<5x16xf32>,
    %c0_44 = arith.constant 0 : index
    %c0_45 = arith.constant 0 : index
    %c224 = arith.constant 224 : index
    %44 = vector.load %arg1[%c0_44, %c0_45, %c224] : memref<1x5x256xf32, #tpu.memory_space<vmem>>, vector<1x5x16xf32>
    %45 = vector.shape_cast %44 : vector<1x5x16xf32> to vector<5x16xf32>
    %c0_46 = arith.constant 0 : index
    %c399 = arith.constant 399 : index
    %46 = vector.load %arg12[%c0_46, %c399] : memref<8x640xf32, #tpu.memory_space<vmem>>, vector<5x16xf32>
    tpu.vector_store %arg12[%c0_46, %c399], %45 {strides = array<i32>} : memref<8x640xf32, #tpu.memory_space<vmem>>, vector<5x16xf32>,
    %c0_47 = arith.constant 0 : index
    %c0_48 = arith.constant 0 : index
    %c240 = arith.constant 240 : index
    %47 = vector.load %arg1[%c0_47, %c0_48, %c240] : memref<1x5x256xf32, #tpu.memory_space<vmem>>, vector<1x5x16xf32>
    %48 = vector.shape_cast %47 : vector<1x5x16xf32> to vector<5x16xf32>
    %c0_49 = arith.constant 0 : index
    %c417 = arith.constant 417 : index
    %49 = vector.load %arg12[%c0_49, %c417] : memref<8x640xf32, #tpu.memory_space<vmem>>, vector<5x16xf32>
    tpu.vector_store %arg12[%c0_49, %c417], %48 {strides = array<i32>} : memref<8x640xf32, #tpu.memory_space<vmem>>, vector<5x16xf32>,
    %c0_50 = arith.constant 0 : index
    %c0_51 = arith.constant 0 : index
    %50 = vector.load %arg2[%c0_50, %c0_51] : memref<1x384xf32, #tpu.memory_space<vmem>>, vector<1x384xf32>
    %c0_52 = arith.constant 0 : index
    %c109 = arith.constant 109 : index
    %51 = vector.load %arg12[%c0_52, %c109] : memref<8x640xf32, #tpu.memory_space<vmem>>, vector<8x384xf32>
    %c0_53 = arith.constant 0 : index
    %c0_54 = arith.constant 0 : index
    %c0_55 = arith.constant 0 : index
    %52 = vector.load %arg3[%c0_53, %c0_54, %c0_55] : memref<9x8x8xf32, #tpu.memory_space<vmem>>, vector<1x8x8xf32>
    %53 = vector.shape_cast %52 : vector<1x8x8xf32> to vector<8x8xf32>
    %cst_56 = arith.constant dense<0.000000e+00> : vector<8x384xf32>
    %54 = tpu.matmul %53, %51, %cst_56 {dimension_numbers = #tpu.dot_dimension_numbers<[1], [0], [0], [1], [0, 0, 1, 1], [], []>} : vector<8x8xf32>, vector<8x384xf32>, vector<8x384xf32> -> vector<8x384xf32>
    %c0_57 = arith.constant 0 : index
    %c110 = arith.constant 110 : index
    %55 = vector.load %arg12[%c0_57, %c110] : memref<8x640xf32, #tpu.memory_space<vmem>>, vector<8x384xf32>
    %c1 = arith.constant 1 : index
    %c0_58 = arith.constant 0 : index
    %c0_59 = arith.constant 0 : index
    %56 = vector.load %arg3[%c1, %c0_58, %c0_59] : memref<9x8x8xf32, #tpu.memory_space<vmem>>, vector<1x8x8xf32>
    %57 = vector.shape_cast %56 : vector<1x8x8xf32> to vector<8x8xf32>
    %cst_60 = arith.constant dense<0.000000e+00> : vector<8x384xf32>
    %58 = tpu.matmul %57, %55, %cst_60 {dimension_numbers = #tpu.dot_dimension_numbers<[1], [0], [0], [1], [0, 0, 1, 1], [], []>} : vector<8x8xf32>, vector<8x384xf32>, vector<8x384xf32> -> vector<8x384xf32>
    %59 = arith.addf %54, %58 : vector<8x384xf32>
    %c0_61 = arith.constant 0 : index
    %c111 = arith.constant 111 : index
    %60 = vector.load %arg12[%c0_61, %c111] : memref<8x640xf32, #tpu.memory_space<vmem>>, vector<8x384xf32>
    %c2 = arith.constant 2 : index
    %c0_62 = arith.constant 0 : index
    %c0_63 = arith.constant 0 : index
    %61 = vector.load %arg3[%c2, %c0_62, %c0_63] : memref<9x8x8xf32, #tpu.memory_space<vmem>>, vector<1x8x8xf32>
    %62 = vector.shape_cast %61 : vector<1x8x8xf32> to vector<8x8xf32>
    %cst_64 = arith.constant dense<0.000000e+00> : vector<8x384xf32>
    %63 = tpu.matmul %62, %60, %cst_64 {dimension_numbers = #tpu.dot_dimension_numbers<[1], [0], [0], [1], [0, 0, 1, 1], [], []>} : vector<8x8xf32>, vector<8x384xf32>, vector<8x384xf32> -> vector<8x384xf32>
    %64 = arith.addf %59, %63 : vector<8x384xf32>
    %c0_65 = arith.constant 0 : index
    %c127 = arith.constant 127 : index
    %65 = vector.load %arg12[%c0_65, %c127] : memref<8x640xf32, #tpu.memory_space<vmem>>, vector<8x384xf32>
    %c3 = arith.constant 3 : index
    %c0_66 = arith.constant 0 : index
    %c0_67 = arith.constant 0 : index
    %66 = vector.load %arg3[%c3, %c0_66, %c0_67] : memref<9x8x8xf32, #tpu.memory_space<vmem>>, vector<1x8x8xf32>
    %67 = vector.shape_cast %66 : vector<1x8x8xf32> to vector<8x8xf32>
    %cst_68 = arith.constant dense<0.000000e+00> : vector<8x384xf32>
    %68 = tpu.matmul %67, %65, %cst_68 {dimension_numbers = #tpu.dot_dimension_numbers<[1], [0], [0], [1], [0, 0, 1, 1], [], []>} : vector<8x8xf32>, vector<8x384xf32>, vector<8x384xf32> -> vector<8x384xf32>
    %69 = arith.addf %64, %68 : vector<8x384xf32>
    %c0_69 = arith.constant 0 : index
    %c128_70 = arith.constant 128 : index
    %70 = vector.load %arg12[%c0_69, %c128_70] : memref<8x640xf32, #tpu.memory_space<vmem>>, vector<8x384xf32>
    %c4 = arith.constant 4 : index
    %c0_71 = arith.constant 0 : index
    %c0_72 = arith.constant 0 : index
    %71 = vector.load %arg3[%c4, %c0_71, %c0_72] : memref<9x8x8xf32, #tpu.memory_space<vmem>>, vector<1x8x8xf32>
    %72 = vector.shape_cast %71 : vector<1x8x8xf32> to vector<8x8xf32>
    %cst_73 = arith.constant dense<0.000000e+00> : vector<8x384xf32>
    %73 = tpu.matmul %72, %70, %cst_73 {dimension_numbers = #tpu.dot_dimension_numbers<[1], [0], [0], [1], [0, 0, 1, 1], [], []>} : vector<8x8xf32>, vector<8x384xf32>, vector<8x384xf32> -> vector<8x384xf32>
    %74 = arith.addf %69, %73 : vector<8x384xf32>
    %c0_74 = arith.constant 0 : index
    %c129 = arith.constant 129 : index
    %75 = vector.load %arg12[%c0_74, %c129] : memref<8x640xf32, #tpu.memory_space<vmem>>, vector<8x384xf32>
    %c5 = arith.constant 5 : index
    %c0_75 = arith.constant 0 : index
    %c0_76 = arith.constant 0 : index
    %76 = vector.load %arg3[%c5, %c0_75, %c0_76] : memref<9x8x8xf32, #tpu.memory_space<vmem>>, vector<1x8x8xf32>
    %77 = vector.shape_cast %76 : vector<1x8x8xf32> to vector<8x8xf32>
    %cst_77 = arith.constant dense<0.000000e+00> : vector<8x384xf32>
    %78 = tpu.matmul %77, %75, %cst_77 {dimension_numbers = #tpu.dot_dimension_numbers<[1], [0], [0], [1], [0, 0, 1, 1], [], []>} : vector<8x8xf32>, vector<8x384xf32>, vector<8x384xf32> -> vector<8x384xf32>
    %79 = arith.addf %74, %78 : vector<8x384xf32>
    %c0_78 = arith.constant 0 : index
    %c145 = arith.constant 145 : index
    %80 = vector.load %arg12[%c0_78, %c145] : memref<8x640xf32, #tpu.memory_space<vmem>>, vector<8x384xf32>
    %c6 = arith.constant 6 : index
    %c0_79 = arith.constant 0 : index
    %c0_80 = arith.constant 0 : index
    %81 = vector.load %arg3[%c6, %c0_79, %c0_80] : memref<9x8x8xf32, #tpu.memory_space<vmem>>, vector<1x8x8xf32>
    %82 = vector.shape_cast %81 : vector<1x8x8xf32> to vector<8x8xf32>
    %cst_81 = arith.constant dense<0.000000e+00> : vector<8x384xf32>
    %83 = tpu.matmul %82, %80, %cst_81 {dimension_numbers = #tpu.dot_dimension_numbers<[1], [0], [0], [1], [0, 0, 1, 1], [], []>} : vector<8x8xf32>, vector<8x384xf32>, vector<8x384xf32> -> vector<8x384xf32>
    %84 = arith.addf %79, %83 : vector<8x384xf32>
    %c0_82 = arith.constant 0 : index
    %c146 = arith.constant 146 : index
    %85 = vector.load %arg12[%c0_82, %c146] : memref<8x640xf32, #tpu.memory_space<vmem>>, vector<8x384xf32>
    %c7 = arith.constant 7 : index
    %c0_83 = arith.constant 0 : index
    %c0_84 = arith.constant 0 : index
    %86 = vector.load %arg3[%c7, %c0_83, %c0_84] : memref<9x8x8xf32, #tpu.memory_space<vmem>>, vector<1x8x8xf32>
    %87 = vector.shape_cast %86 : vector<1x8x8xf32> to vector<8x8xf32>
    %cst_85 = arith.constant dense<0.000000e+00> : vector<8x384xf32>
    %88 = tpu.matmul %87, %85, %cst_85 {dimension_numbers = #tpu.dot_dimension_numbers<[1], [0], [0], [1], [0, 0, 1, 1], [], []>} : vector<8x8xf32>, vector<8x384xf32>, vector<8x384xf32> -> vector<8x384xf32>
    %89 = arith.addf %84, %88 : vector<8x384xf32>
    %c0_86 = arith.constant 0 : index
    %c147_87 = arith.constant 147 : index
    %90 = vector.load %arg12[%c0_86, %c147_87] : memref<8x640xf32, #tpu.memory_space<vmem>>, vector<8x384xf32>
    %c8 = arith.constant 8 : index
    %c0_88 = arith.constant 0 : index
    %c0_89 = arith.constant 0 : index
    %91 = vector.load %arg3[%c8, %c0_88, %c0_89] : memref<9x8x8xf32, #tpu.memory_space<vmem>>, vector<1x8x8xf32>
    %92 = vector.shape_cast %91 : vector<1x8x8xf32> to vector<8x8xf32>
    %cst_90 = arith.constant dense<0.000000e+00> : vector<8x384xf32>
    %93 = tpu.matmul %92, %90, %cst_90 {dimension_numbers = #tpu.dot_dimension_numbers<[1], [0], [0], [1], [0, 0, 1, 1], [], []>} : vector<8x8xf32>, vector<8x384xf32>, vector<8x384xf32> -> vector<8x384xf32>
    %94 = arith.addf %89, %93 : vector<8x384xf32>
    %c0_91 = arith.constant 0 : index
    %c0_92 = arith.constant 0 : index
    %95 = vector.load %arg4[%c0_91, %c0_92] : memref<8x1xf32, #tpu.memory_space<vmem>>, vector<8x1xf32>
    %96 = vector.broadcast %95 : vector<8x1xf32> to vector<8x384xf32>
    %97 = arith.addf %94, %96 : vector<8x384xf32>
    %cst_93 = arith.constant 0.000000e+00 : f32
    %98 = vector.broadcast %cst_93 : f32 to vector<8x384xf32>
    %99 = arith.cmpf ogt, %97, %98 : vector<8x384xf32>
    %cst_94 = arith.constant 0.00999999977 : f32
    %100 = vector.broadcast %cst_94 : f32 to vector<8x384xf32>
    %101 = arith.mulf %100, %97 : vector<8x384xf32>
    %102 = arith.select %99, %97, %101 : vector<8x384xi1>, vector<8x384xf32>
    %103 = vector.broadcast %50 : vector<1x384xf32> to vector<8x384xf32>
    %104 = arith.mulf %102, %103 : vector<8x384xf32>
    %c0_95 = arith.constant 0 : index
    %c128_96 = arith.constant 128 : index
    %105 = vector.load %arg12[%c0_95, %c128_96] : memref<8x640xf32, #tpu.memory_space<vmem>>, vector<8x384xf32>
    tpu.vector_store %arg12[%c0_95, %c128_96], %104 {strides = array<i32>} : memref<8x640xf32, #tpu.memory_space<vmem>>, vector<8x384xf32>,
    %c0_97 = arith.constant 0 : index
    %c109_98 = arith.constant 109 : index
    %106 = vector.load %arg12[%c0_97, %c109_98] : memref<8x640xf32, #tpu.memory_space<vmem>>, vector<8x384xf32>
    %c0_99 = arith.constant 0 : index
    %c0_100 = arith.constant 0 : index
    %c0_101 = arith.constant 0 : index
    %107 = vector.load %arg5[%c0_99, %c0_100, %c0_101] : memref<9x8x8xf32, #tpu.memory_space<vmem>>, vector<1x8x8xf32>
    %108 = vector.shape_cast %107 : vector<1x8x8xf32> to vector<8x8xf32>
    %cst_102 = arith.constant dense<0.000000e+00> : vector<8x384xf32>
    %109 = tpu.matmul %108, %106, %cst_102 {dimension_numbers = #tpu.dot_dimension_numbers<[1], [0], [0], [1], [0, 0, 1, 1], [], []>} : vector<8x8xf32>, vector<8x384xf32>, vector<8x384xf32> -> vector<8x384xf32>
    %c0_103 = arith.constant 0 : index
    %c110_104 = arith.constant 110 : index
    %110 = vector.load %arg12[%c0_103, %c110_104] : memref<8x640xf32, #tpu.memory_space<vmem>>, vector<8x384xf32>
    %c1_105 = arith.constant 1 : index
    %c0_106 = arith.constant 0 : index
    %c0_107 = arith.constant 0 : index
    %111 = vector.load %arg5[%c1_105, %c0_106, %c0_107] : memref<9x8x8xf32, #tpu.memory_space<vmem>>, vector<1x8x8xf32>
    %112 = vector.shape_cast %111 : vector<1x8x8xf32> to vector<8x8xf32>
    %cst_108 = arith.constant dense<0.000000e+00> : vector<8x384xf32>
    %113 = tpu.matmul %112, %110, %cst_108 {dimension_numbers = #tpu.dot_dimension_numbers<[1], [0], [0], [1], [0, 0, 1, 1], [], []>} : vector<8x8xf32>, vector<8x384xf32>, vector<8x384xf32> -> vector<8x384xf32>
    %114 = arith.addf %109, %113 : vector<8x384xf32>
    %c0_109 = arith.constant 0 : index
    %c111_110 = arith.constant 111 : index
    %115 = vector.load %arg12[%c0_109, %c111_110] : memref<8x640xf32, #tpu.memory_space<vmem>>, vector<8x384xf32>
    %c2_111 = arith.constant 2 : index
    %c0_112 = arith.constant 0 : index
    %c0_113 = arith.constant 0 : index
    %116 = vector.load %arg5[%c2_111, %c0_112, %c0_113] : memref<9x8x8xf32, #tpu.memory_space<vmem>>, vector<1x8x8xf32>
    %117 = vector.shape_cast %116 : vector<1x8x8xf32> to vector<8x8xf32>
    %cst_114 = arith.constant dense<0.000000e+00> : vector<8x384xf32>
    %118 = tpu.matmul %117, %115, %cst_114 {dimension_numbers = #tpu.dot_dimension_numbers<[1], [0], [0], [1], [0, 0, 1, 1], [], []>} : vector<8x8xf32>, vector<8x384xf32>, vector<8x384xf32> -> vector<8x384xf32>
    %119 = arith.addf %114, %118 : vector<8x384xf32>
    %c0_115 = arith.constant 0 : index
    %c127_116 = arith.constant 127 : index
    %120 = vector.load %arg12[%c0_115, %c127_116] : memref<8x640xf32, #tpu.memory_space<vmem>>, vector<8x384xf32>
    %c3_117 = arith.constant 3 : index
    %c0_118 = arith.constant 0 : index
    %c0_119 = arith.constant 0 : index
    %121 = vector.load %arg5[%c3_117, %c0_118, %c0_119] : memref<9x8x8xf32, #tpu.memory_space<vmem>>, vector<1x8x8xf32>
    %122 = vector.shape_cast %121 : vector<1x8x8xf32> to vector<8x8xf32>
    %cst_120 = arith.constant dense<0.000000e+00> : vector<8x384xf32>
    %123 = tpu.matmul %122, %120, %cst_120 {dimension_numbers = #tpu.dot_dimension_numbers<[1], [0], [0], [1], [0, 0, 1, 1], [], []>} : vector<8x8xf32>, vector<8x384xf32>, vector<8x384xf32> -> vector<8x384xf32>
    %124 = arith.addf %119, %123 : vector<8x384xf32>
    %c0_121 = arith.constant 0 : index
    %c128_122 = arith.constant 128 : index
    %125 = vector.load %arg12[%c0_121, %c128_122] : memref<8x640xf32, #tpu.memory_space<vmem>>, vector<8x384xf32>
    %c4_123 = arith.constant 4 : index
    %c0_124 = arith.constant 0 : index
    %c0_125 = arith.constant 0 : index
    %126 = vector.load %arg5[%c4_123, %c0_124, %c0_125] : memref<9x8x8xf32, #tpu.memory_space<vmem>>, vector<1x8x8xf32>
    %127 = vector.shape_cast %126 : vector<1x8x8xf32> to vector<8x8xf32>
    %cst_126 = arith.constant dense<0.000000e+00> : vector<8x384xf32>
    %128 = tpu.matmul %127, %125, %cst_126 {dimension_numbers = #tpu.dot_dimension_numbers<[1], [0], [0], [1], [0, 0, 1, 1], [], []>} : vector<8x8xf32>, vector<8x384xf32>, vector<8x384xf32> -> vector<8x384xf32>
    %129 = arith.addf %124, %128 : vector<8x384xf32>
    %c0_127 = arith.constant 0 : index
    %c129_128 = arith.constant 129 : index
    %130 = vector.load %arg12[%c0_127, %c129_128] : memref<8x640xf32, #tpu.memory_space<vmem>>, vector<8x384xf32>
    %c5_129 = arith.constant 5 : index
    %c0_130 = arith.constant 0 : index
    %c0_131 = arith.constant 0 : index
    %131 = vector.load %arg5[%c5_129, %c0_130, %c0_131] : memref<9x8x8xf32, #tpu.memory_space<vmem>>, vector<1x8x8xf32>
    %132 = vector.shape_cast %131 : vector<1x8x8xf32> to vector<8x8xf32>
    %cst_132 = arith.constant dense<0.000000e+00> : vector<8x384xf32>
    %133 = tpu.matmul %132, %130, %cst_132 {dimension_numbers = #tpu.dot_dimension_numbers<[1], [0], [0], [1], [0, 0, 1, 1], [], []>} : vector<8x8xf32>, vector<8x384xf32>, vector<8x384xf32> -> vector<8x384xf32>
    %134 = arith.addf %129, %133 : vector<8x384xf32>
    %c0_133 = arith.constant 0 : index
    %c145_134 = arith.constant 145 : index
    %135 = vector.load %arg12[%c0_133, %c145_134] : memref<8x640xf32, #tpu.memory_space<vmem>>, vector<8x384xf32>
    %c6_135 = arith.constant 6 : index
    %c0_136 = arith.constant 0 : index
    %c0_137 = arith.constant 0 : index
    %136 = vector.load %arg5[%c6_135, %c0_136, %c0_137] : memref<9x8x8xf32, #tpu.memory_space<vmem>>, vector<1x8x8xf32>
    %137 = vector.shape_cast %136 : vector<1x8x8xf32> to vector<8x8xf32>
    %cst_138 = arith.constant dense<0.000000e+00> : vector<8x384xf32>
    %138 = tpu.matmul %137, %135, %cst_138 {dimension_numbers = #tpu.dot_dimension_numbers<[1], [0], [0], [1], [0, 0, 1, 1], [], []>} : vector<8x8xf32>, vector<8x384xf32>, vector<8x384xf32> -> vector<8x384xf32>
    %139 = arith.addf %134, %138 : vector<8x384xf32>
    %c0_139 = arith.constant 0 : index
    %c146_140 = arith.constant 146 : index
    %140 = vector.load %arg12[%c0_139, %c146_140] : memref<8x640xf32, #tpu.memory_space<vmem>>, vector<8x384xf32>
    %c7_141 = arith.constant 7 : index
    %c0_142 = arith.constant 0 : index
    %c0_143 = arith.constant 0 : index
    %141 = vector.load %arg5[%c7_141, %c0_142, %c0_143] : memref<9x8x8xf32, #tpu.memory_space<vmem>>, vector<1x8x8xf32>
    %142 = vector.shape_cast %141 : vector<1x8x8xf32> to vector<8x8xf32>
    %cst_144 = arith.constant dense<0.000000e+00> : vector<8x384xf32>
    %143 = tpu.matmul %142, %140, %cst_144 {dimension_numbers = #tpu.dot_dimension_numbers<[1], [0], [0], [1], [0, 0, 1, 1], [], []>} : vector<8x8xf32>, vector<8x384xf32>, vector<8x384xf32> -> vector<8x384xf32>
    %144 = arith.addf %139, %143 : vector<8x384xf32>
    %c0_145 = arith.constant 0 : index
    %c147_146 = arith.constant 147 : index
    %145 = vector.load %arg12[%c0_145, %c147_146] : memref<8x640xf32, #tpu.memory_space<vmem>>, vector<8x384xf32>
    %c8_147 = arith.constant 8 : index
    %c0_148 = arith.constant 0 : index
    %c0_149 = arith.constant 0 : index
    %146 = vector.load %arg5[%c8_147, %c0_148, %c0_149] : memref<9x8x8xf32, #tpu.memory_space<vmem>>, vector<1x8x8xf32>
    %147 = vector.shape_cast %146 : vector<1x8x8xf32> to vector<8x8xf32>
    %cst_150 = arith.constant dense<0.000000e+00> : vector<8x384xf32>
    %148 = tpu.matmul %147, %145, %cst_150 {dimension_numbers = #tpu.dot_dimension_numbers<[1], [0], [0], [1], [0, 0, 1, 1], [], []>} : vector<8x8xf32>, vector<8x384xf32>, vector<8x384xf32> -> vector<8x384xf32>
    %149 = arith.addf %144, %148 : vector<8x384xf32>
    %c0_151 = arith.constant 0 : index
    %c0_152 = arith.constant 0 : index
    %150 = vector.load %arg6[%c0_151, %c0_152] : memref<8x1xf32, #tpu.memory_space<vmem>>, vector<8x1xf32>
    %151 = vector.broadcast %150 : vector<8x1xf32> to vector<8x384xf32>
    %152 = arith.addf %149, %151 : vector<8x384xf32>
    %cst_153 = arith.constant 0.000000e+00 : f32
    %153 = vector.broadcast %cst_153 : f32 to vector<8x384xf32>
    %154 = arith.maximumf %152, %153 : vector<8x384xf32>
    %155 = vector.broadcast %50 : vector<1x384xf32> to vector<8x384xf32>
    %156 = arith.mulf %154, %155 : vector<8x384xf32>
    %c0_154 = arith.constant 0 : index
    %c128_155 = arith.constant 128 : index
    %157 = vector.load %arg12[%c0_154, %c128_155] : memref<8x640xf32, #tpu.memory_space<vmem>>, vector<8x384xf32>
    tpu.vector_store %arg12[%c0_154, %c128_155], %156 {strides = array<i32>} : memref<8x640xf32, #tpu.memory_space<vmem>>, vector<8x384xf32>,
    %c0_156 = arith.constant 0 : index
    %c109_157 = arith.constant 109 : index
    %158 = vector.load %arg12[%c0_156, %c109_157] : memref<8x640xf32, #tpu.memory_space<vmem>>, vector<8x384xf32>
    %c0_158 = arith.constant 0 : index
    %c0_159 = arith.constant 0 : index
    %c0_160 = arith.constant 0 : index
    %159 = vector.load %arg7[%c0_158, %c0_159, %c0_160] : memref<9x8x8xf32, #tpu.memory_space<vmem>>, vector<1x8x8xf32>
    %160 = vector.shape_cast %159 : vector<1x8x8xf32> to vector<8x8xf32>
    %cst_161 = arith.constant dense<0.000000e+00> : vector<8x384xf32>
    %161 = tpu.matmul %160, %158, %cst_161 {dimension_numbers = #tpu.dot_dimension_numbers<[1], [0], [0], [1], [0, 0, 1, 1], [], []>} : vector<8x8xf32>, vector<8x384xf32>, vector<8x384xf32> -> vector<8x384xf32>
    %c0_162 = arith.constant 0 : index
    %c110_163 = arith.constant 110 : index
    %162 = vector.load %arg12[%c0_162, %c110_163] : memref<8x640xf32, #tpu.memory_space<vmem>>, vector<8x384xf32>
    %c1_164 = arith.constant 1 : index
    %c0_165 = arith.constant 0 : index
    %c0_166 = arith.constant 0 : index
    %163 = vector.load %arg7[%c1_164, %c0_165, %c0_166] : memref<9x8x8xf32, #tpu.memory_space<vmem>>, vector<1x8x8xf32>
    %164 = vector.shape_cast %163 : vector<1x8x8xf32> to vector<8x8xf32>
    %cst_167 = arith.constant dense<0.000000e+00> : vector<8x384xf32>
    %165 = tpu.matmul %164, %162, %cst_167 {dimension_numbers = #tpu.dot_dimension_numbers<[1], [0], [0], [1], [0, 0, 1, 1], [], []>} : vector<8x8xf32>, vector<8x384xf32>, vector<8x384xf32> -> vector<8x384xf32>
    %166 = arith.addf %161, %165 : vector<8x384xf32>
    %c0_168 = arith.constant 0 : index
    %c111_169 = arith.constant 111 : index
    %167 = vector.load %arg12[%c0_168, %c111_169] : memref<8x640xf32, #tpu.memory_space<vmem>>, vector<8x384xf32>
    %c2_170 = arith.constant 2 : index
    %c0_171 = arith.constant 0 : index
    %c0_172 = arith.constant 0 : index
    %168 = vector.load %arg7[%c2_170, %c0_171, %c0_172] : memref<9x8x8xf32, #tpu.memory_space<vmem>>, vector<1x8x8xf32>
    %169 = vector.shape_cast %168 : vector<1x8x8xf32> to vector<8x8xf32>
    %cst_173 = arith.constant dense<0.000000e+00> : vector<8x384xf32>
    %170 = tpu.matmul %169, %167, %cst_173 {dimension_numbers = #tpu.dot_dimension_numbers<[1], [0], [0], [1], [0, 0, 1, 1], [], []>} : vector<8x8xf32>, vector<8x384xf32>, vector<8x384xf32> -> vector<8x384xf32>
    %171 = arith.addf %166, %170 : vector<8x384xf32>
    %c0_174 = arith.constant 0 : index
    %c127_175 = arith.constant 127 : index
    %172 = vector.load %arg12[%c0_174, %c127_175] : memref<8x640xf32, #tpu.memory_space<vmem>>, vector<8x384xf32>
    %c3_176 = arith.constant 3 : index
    %c0_177 = arith.constant 0 : index
    %c0_178 = arith.constant 0 : index
    %173 = vector.load %arg7[%c3_176, %c0_177, %c0_178] : memref<9x8x8xf32, #tpu.memory_space<vmem>>, vector<1x8x8xf32>
    %174 = vector.shape_cast %173 : vector<1x8x8xf32> to vector<8x8xf32>
    %cst_179 = arith.constant dense<0.000000e+00> : vector<8x384xf32>
    %175 = tpu.matmul %174, %172, %cst_179 {dimension_numbers = #tpu.dot_dimension_numbers<[1], [0], [0], [1], [0, 0, 1, 1], [], []>} : vector<8x8xf32>, vector<8x384xf32>, vector<8x384xf32> -> vector<8x384xf32>
    %176 = arith.addf %171, %175 : vector<8x384xf32>
    %c0_180 = arith.constant 0 : index
    %c128_181 = arith.constant 128 : index
    %177 = vector.load %arg12[%c0_180, %c128_181] : memref<8x640xf32, #tpu.memory_space<vmem>>, vector<8x384xf32>
    %c4_182 = arith.constant 4 : index
    %c0_183 = arith.constant 0 : index
    %c0_184 = arith.constant 0 : index
    %178 = vector.load %arg7[%c4_182, %c0_183, %c0_184] : memref<9x8x8xf32, #tpu.memory_space<vmem>>, vector<1x8x8xf32>
    %179 = vector.shape_cast %178 : vector<1x8x8xf32> to vector<8x8xf32>
    %cst_185 = arith.constant dense<0.000000e+00> : vector<8x384xf32>
    %180 = tpu.matmul %179, %177, %cst_185 {dimension_numbers = #tpu.dot_dimension_numbers<[1], [0], [0], [1], [0, 0, 1, 1], [], []>} : vector<8x8xf32>, vector<8x384xf32>, vector<8x384xf32> -> vector<8x384xf32>
    %181 = arith.addf %176, %180 : vector<8x384xf32>
    %c0_186 = arith.constant 0 : index
    %c129_187 = arith.constant 129 : index
    %182 = vector.load %arg12[%c0_186, %c129_187] : memref<8x640xf32, #tpu.memory_space<vmem>>, vector<8x384xf32>
    %c5_188 = arith.constant 5 : index
    %c0_189 = arith.constant 0 : index
    %c0_190 = arith.constant 0 : index
    %183 = vector.load %arg7[%c5_188, %c0_189, %c0_190] : memref<9x8x8xf32, #tpu.memory_space<vmem>>, vector<1x8x8xf32>
    %184 = vector.shape_cast %183 : vector<1x8x8xf32> to vector<8x8xf32>
    %cst_191 = arith.constant dense<0.000000e+00> : vector<8x384xf32>
    %185 = tpu.matmul %184, %182, %cst_191 {dimension_numbers = #tpu.dot_dimension_numbers<[1], [0], [0], [1], [0, 0, 1, 1], [], []>} : vector<8x8xf32>, vector<8x384xf32>, vector<8x384xf32> -> vector<8x384xf32>
    %186 = arith.addf %181, %185 : vector<8x384xf32>
    %c0_192 = arith.constant 0 : index
    %c145_193 = arith.constant 145 : index
    %187 = vector.load %arg12[%c0_192, %c145_193] : memref<8x640xf32, #tpu.memory_space<vmem>>, vector<8x384xf32>
    %c6_194 = arith.constant 6 : index
    %c0_195 = arith.constant 0 : index
    %c0_196 = arith.constant 0 : index
    %188 = vector.load %arg7[%c6_194, %c0_195, %c0_196] : memref<9x8x8xf32, #tpu.memory_space<vmem>>, vector<1x8x8xf32>
    %189 = vector.shape_cast %188 : vector<1x8x8xf32> to vector<8x8xf32>
    %cst_197 = arith.constant dense<0.000000e+00> : vector<8x384xf32>
    %190 = tpu.matmul %189, %187, %cst_197 {dimension_numbers = #tpu.dot_dimension_numbers<[1], [0], [0], [1], [0, 0, 1, 1], [], []>} : vector<8x8xf32>, vector<8x384xf32>, vector<8x384xf32> -> vector<8x384xf32>
    %191 = arith.addf %186, %190 : vector<8x384xf32>
    %c0_198 = arith.constant 0 : index
    %c146_199 = arith.constant 146 : index
    %192 = vector.load %arg12[%c0_198, %c146_199] : memref<8x640xf32, #tpu.memory_space<vmem>>, vector<8x384xf32>
    %c7_200 = arith.constant 7 : index
    %c0_201 = arith.constant 0 : index
    %c0_202 = arith.constant 0 : index
    %193 = vector.load %arg7[%c7_200, %c0_201, %c0_202] : memref<9x8x8xf32, #tpu.memory_space<vmem>>, vector<1x8x8xf32>
    %194 = vector.shape_cast %193 : vector<1x8x8xf32> to vector<8x8xf32>
    %cst_203 = arith.constant dense<0.000000e+00> : vector<8x384xf32>
    %195 = tpu.matmul %194, %192, %cst_203 {dimension_numbers = #tpu.dot_dimension_numbers<[1], [0], [0], [1], [0, 0, 1, 1], [], []>} : vector<8x8xf32>, vector<8x384xf32>, vector<8x384xf32> -> vector<8x384xf32>
    %196 = arith.addf %191, %195 : vector<8x384xf32>
    %c0_204 = arith.constant 0 : index
    %c147_205 = arith.constant 147 : index
    %197 = vector.load %arg12[%c0_204, %c147_205] : memref<8x640xf32, #tpu.memory_space<vmem>>, vector<8x384xf32>
    %c8_206 = arith.constant 8 : index
    %c0_207 = arith.constant 0 : index
    %c0_208 = arith.constant 0 : index
    %198 = vector.load %arg7[%c8_206, %c0_207, %c0_208] : memref<9x8x8xf32, #tpu.memory_space<vmem>>, vector<1x8x8xf32>
    %199 = vector.shape_cast %198 : vector<1x8x8xf32> to vector<8x8xf32>
    %cst_209 = arith.constant dense<0.000000e+00> : vector<8x384xf32>
    %200 = tpu.matmul %199, %197, %cst_209 {dimension_numbers = #tpu.dot_dimension_numbers<[1], [0], [0], [1], [0, 0, 1, 1], [], []>} : vector<8x8xf32>, vector<8x384xf32>, vector<8x384xf32> -> vector<8x384xf32>
    %201 = arith.addf %196, %200 : vector<8x384xf32>
    %c0_210 = arith.constant 0 : index
    %c0_211 = arith.constant 0 : index
    %202 = vector.load %arg8[%c0_210, %c0_211] : memref<8x1xf32, #tpu.memory_space<vmem>>, vector<8x1xf32>
    %203 = vector.broadcast %202 : vector<8x1xf32> to vector<8x384xf32>
    %204 = arith.addf %201, %203 : vector<8x384xf32>
    %cst_212 = arith.constant 0.000000e+00 : f32
    %205 = vector.broadcast %cst_212 : f32 to vector<8x384xf32>
    %206 = arith.maximumf %204, %205 : vector<8x384xf32>
    %207 = vector.broadcast %50 : vector<1x384xf32> to vector<8x384xf32>
    %208 = arith.mulf %206, %207 : vector<8x384xf32>
    %c0_213 = arith.constant 0 : index
    %c128_214 = arith.constant 128 : index
    %209 = vector.load %arg12[%c0_213, %c128_214] : memref<8x640xf32, #tpu.memory_space<vmem>>, vector<8x384xf32>
    tpu.vector_store %arg12[%c0_213, %c128_214], %208 {strides = array<i32>} : memref<8x640xf32, #tpu.memory_space<vmem>>, vector<8x384xf32>,
    %c0_215 = arith.constant 0 : index
    %c109_216 = arith.constant 109 : index
    %210 = vector.load %arg12[%c0_215, %c109_216] : memref<8x640xf32, #tpu.memory_space<vmem>>, vector<8x384xf32>
    %c0_217 = arith.constant 0 : index
    %c0_218 = arith.constant 0 : index
    %c0_219 = arith.constant 0 : index
    %211 = vector.load %arg9[%c0_217, %c0_218, %c0_219] : memref<9x8x8xf32, #tpu.memory_space<vmem>>, vector<1x8x8xf32>
    %212 = vector.shape_cast %211 : vector<1x8x8xf32> to vector<8x8xf32>
    %cst_220 = arith.constant dense<0.000000e+00> : vector<8x384xf32>
    %213 = tpu.matmul %212, %210, %cst_220 {dimension_numbers = #tpu.dot_dimension_numbers<[1], [0], [0], [1], [0, 0, 1, 1], [], []>} : vector<8x8xf32>, vector<8x384xf32>, vector<8x384xf32> -> vector<8x384xf32>
    %c0_221 = arith.constant 0 : index
    %c110_222 = arith.constant 110 : index
    %214 = vector.load %arg12[%c0_221, %c110_222] : memref<8x640xf32, #tpu.memory_space<vmem>>, vector<8x384xf32>
    %c1_223 = arith.constant 1 : index
    %c0_224 = arith.constant 0 : index
    %c0_225 = arith.constant 0 : index
    %215 = vector.load %arg9[%c1_223, %c0_224, %c0_225] : memref<9x8x8xf32, #tpu.memory_space<vmem>>, vector<1x8x8xf32>
    %216 = vector.shape_cast %215 : vector<1x8x8xf32> to vector<8x8xf32>
    %cst_226 = arith.constant dense<0.000000e+00> : vector<8x384xf32>
    %217 = tpu.matmul %216, %214, %cst_226 {dimension_numbers = #tpu.dot_dimension_numbers<[1], [0], [0], [1], [0, 0, 1, 1], [], []>} : vector<8x8xf32>, vector<8x384xf32>, vector<8x384xf32> -> vector<8x384xf32>
    %218 = arith.addf %213, %217 : vector<8x384xf32>
    %c0_227 = arith.constant 0 : index
    %c111_228 = arith.constant 111 : index
    %219 = vector.load %arg12[%c0_227, %c111_228] : memref<8x640xf32, #tpu.memory_space<vmem>>, vector<8x384xf32>
    %c2_229 = arith.constant 2 : index
    %c0_230 = arith.constant 0 : index
    %c0_231 = arith.constant 0 : index
    %220 = vector.load %arg9[%c2_229, %c0_230, %c0_231] : memref<9x8x8xf32, #tpu.memory_space<vmem>>, vector<1x8x8xf32>
    %221 = vector.shape_cast %220 : vector<1x8x8xf32> to vector<8x8xf32>
    %cst_232 = arith.constant dense<0.000000e+00> : vector<8x384xf32>
    %222 = tpu.matmul %221, %219, %cst_232 {dimension_numbers = #tpu.dot_dimension_numbers<[1], [0], [0], [1], [0, 0, 1, 1], [], []>} : vector<8x8xf32>, vector<8x384xf32>, vector<8x384xf32> -> vector<8x384xf32>
    %223 = arith.addf %218, %222 : vector<8x384xf32>
    %c0_233 = arith.constant 0 : index
    %c127_234 = arith.constant 127 : index
    %224 = vector.load %arg12[%c0_233, %c127_234] : memref<8x640xf32, #tpu.memory_space<vmem>>, vector<8x384xf32>
    %c3_235 = arith.constant 3 : index
    %c0_236 = arith.constant 0 : index
    %c0_237 = arith.constant 0 : index
    %225 = vector.load %arg9[%c3_235, %c0_236, %c0_237] : memref<9x8x8xf32, #tpu.memory_space<vmem>>, vector<1x8x8xf32>
    %226 = vector.shape_cast %225 : vector<1x8x8xf32> to vector<8x8xf32>
    %cst_238 = arith.constant dense<0.000000e+00> : vector<8x384xf32>
    %227 = tpu.matmul %226, %224, %cst_238 {dimension_numbers = #tpu.dot_dimension_numbers<[1], [0], [0], [1], [0, 0, 1, 1], [], []>} : vector<8x8xf32>, vector<8x384xf32>, vector<8x384xf32> -> vector<8x384xf32>
    %228 = arith.addf %223, %227 : vector<8x384xf32>
    %c0_239 = arith.constant 0 : index
    %c128_240 = arith.constant 128 : index
    %229 = vector.load %arg12[%c0_239, %c128_240] : memref<8x640xf32, #tpu.memory_space<vmem>>, vector<8x384xf32>
    %c4_241 = arith.constant 4 : index
    %c0_242 = arith.constant 0 : index
    %c0_243 = arith.constant 0 : index
    %230 = vector.load %arg9[%c4_241, %c0_242, %c0_243] : memref<9x8x8xf32, #tpu.memory_space<vmem>>, vector<1x8x8xf32>
    %231 = vector.shape_cast %230 : vector<1x8x8xf32> to vector<8x8xf32>
    %cst_244 = arith.constant dense<0.000000e+00> : vector<8x384xf32>
    %232 = tpu.matmul %231, %229, %cst_244 {dimension_numbers = #tpu.dot_dimension_numbers<[1], [0], [0], [1], [0, 0, 1, 1], [], []>} : vector<8x8xf32>, vector<8x384xf32>, vector<8x384xf32> -> vector<8x384xf32>
    %233 = arith.addf %228, %232 : vector<8x384xf32>
    %c0_245 = arith.constant 0 : index
    %c129_246 = arith.constant 129 : index
    %234 = vector.load %arg12[%c0_245, %c129_246] : memref<8x640xf32, #tpu.memory_space<vmem>>, vector<8x384xf32>
    %c5_247 = arith.constant 5 : index
    %c0_248 = arith.constant 0 : index
    %c0_249 = arith.constant 0 : index
    %235 = vector.load %arg9[%c5_247, %c0_248, %c0_249] : memref<9x8x8xf32, #tpu.memory_space<vmem>>, vector<1x8x8xf32>
    %236 = vector.shape_cast %235 : vector<1x8x8xf32> to vector<8x8xf32>
    %cst_250 = arith.constant dense<0.000000e+00> : vector<8x384xf32>
    %237 = tpu.matmul %236, %234, %cst_250 {dimension_numbers = #tpu.dot_dimension_numbers<[1], [0], [0], [1], [0, 0, 1, 1], [], []>} : vector<8x8xf32>, vector<8x384xf32>, vector<8x384xf32> -> vector<8x384xf32>
    %238 = arith.addf %233, %237 : vector<8x384xf32>
    %c0_251 = arith.constant 0 : index
    %c145_252 = arith.constant 145 : index
    %239 = vector.load %arg12[%c0_251, %c145_252] : memref<8x640xf32, #tpu.memory_space<vmem>>, vector<8x384xf32>
    %c6_253 = arith.constant 6 : index
    %c0_254 = arith.constant 0 : index
    %c0_255 = arith.constant 0 : index
    %240 = vector.load %arg9[%c6_253, %c0_254, %c0_255] : memref<9x8x8xf32, #tpu.memory_space<vmem>>, vector<1x8x8xf32>
    %241 = vector.shape_cast %240 : vector<1x8x8xf32> to vector<8x8xf32>
    %cst_256 = arith.constant dense<0.000000e+00> : vector<8x384xf32>
    %242 = tpu.matmul %241, %239, %cst_256 {dimension_numbers = #tpu.dot_dimension_numbers<[1], [0], [0], [1], [0, 0, 1, 1], [], []>} : vector<8x8xf32>, vector<8x384xf32>, vector<8x384xf32> -> vector<8x384xf32>
    %243 = arith.addf %238, %242 : vector<8x384xf32>
    %c0_257 = arith.constant 0 : index
    %c146_258 = arith.constant 146 : index
    %244 = vector.load %arg12[%c0_257, %c146_258] : memref<8x640xf32, #tpu.memory_space<vmem>>, vector<8x384xf32>
    %c7_259 = arith.constant 7 : index
    %c0_260 = arith.constant 0 : index
    %c0_261 = arith.constant 0 : index
    %245 = vector.load %arg9[%c7_259, %c0_260, %c0_261] : memref<9x8x8xf32, #tpu.memory_space<vmem>>, vector<1x8x8xf32>
    %246 = vector.shape_cast %245 : vector<1x8x8xf32> to vector<8x8xf32>
    %cst_262 = arith.constant dense<0.000000e+00> : vector<8x384xf32>
    %247 = tpu.matmul %246, %244, %cst_262 {dimension_numbers = #tpu.dot_dimension_numbers<[1], [0], [0], [1], [0, 0, 1, 1], [], []>} : vector<8x8xf32>, vector<8x384xf32>, vector<8x384xf32> -> vector<8x384xf32>
    %248 = arith.addf %243, %247 : vector<8x384xf32>
    %c0_263 = arith.constant 0 : index
    %c147_264 = arith.constant 147 : index
    %249 = vector.load %arg12[%c0_263, %c147_264] : memref<8x640xf32, #tpu.memory_space<vmem>>, vector<8x384xf32>
    %c8_265 = arith.constant 8 : index
    %c0_266 = arith.constant 0 : index
    %c0_267 = arith.constant 0 : index
    %250 = vector.load %arg9[%c8_265, %c0_266, %c0_267] : memref<9x8x8xf32, #tpu.memory_space<vmem>>, vector<1x8x8xf32>
    %251 = vector.shape_cast %250 : vector<1x8x8xf32> to vector<8x8xf32>
    %cst_268 = arith.constant dense<0.000000e+00> : vector<8x384xf32>
    %252 = tpu.matmul %251, %249, %cst_268 {dimension_numbers = #tpu.dot_dimension_numbers<[1], [0], [0], [1], [0, 0, 1, 1], [], []>} : vector<8x8xf32>, vector<8x384xf32>, vector<8x384xf32> -> vector<8x384xf32>
    %253 = arith.addf %248, %252 : vector<8x384xf32>
    %c0_269 = arith.constant 0 : index
    %c0_270 = arith.constant 0 : index
    %254 = vector.load %arg10[%c0_269, %c0_270] : memref<8x1xf32, #tpu.memory_space<vmem>>, vector<8x1xf32>
    %255 = vector.broadcast %254 : vector<8x1xf32> to vector<8x384xf32>
    %256 = arith.addf %253, %255 : vector<8x384xf32>
    %c0_271 = arith.constant 0 : index
    %c0_272 = arith.constant 0 : index
    %c0_273 = arith.constant 0 : index
    %257 = vector.load %arg11[%c0_271, %c0_272, %c0_273] : memref<1x8x384xf32, #tpu.memory_space<vmem>>, vector<1x8x384xf32>
    %258 = vector.shape_cast %257 : vector<1x8x384xf32> to vector<8x384xf32>
    %259 = vector.shape_cast %256 : vector<8x384xf32> to vector<1x8x384xf32>
    tpu.vector_store %arg11[%c0_271, %c0_272, %c0_273], %259 {strides = array<i32>} : memref<1x8x384xf32, #tpu.memory_space<vmem>>, vector<1x8x384xf32>,
    return
  }
  func.func @transform_0(%arg0: i32) -> (i32, i32, i32) {
    %c0_i32 = arith.constant 0 : i32
    %c0_i32_0 = arith.constant 0 : i32
    %c0_i32_1 = arith.constant 0 : i32
    return %arg0, %c0_i32, %c0_i32_0 : i32, i32, i32
  }
  func.func @transform_1(%arg0: i32) -> (i32, i32) {
    %c0_i32 = arith.constant 0 : i32
    %c0_i32_0 = arith.constant 0 : i32
    %c0_i32_1 = arith.constant 0 : i32
    return %c0_i32, %c0_i32_0 : i32, i32
  }
  func.func @transform_2(%arg0: i32) -> (i32, i32, i32) {
    %c0_i32 = arith.constant 0 : i32
    %c0_i32_0 = arith.constant 0 : i32
    %c0_i32_1 = arith.constant 0 : i32
    %c0_i32_2 = arith.constant 0 : i32
    return %c0_i32, %c0_i32_0, %c0_i32_1 : i32, i32, i32
  }
  func.func @transform_3(%arg0: i32) -> (i32, i32) {
    %c0_i32 = arith.constant 0 : i32
    %c0_i32_0 = arith.constant 0 : i32
    %c0_i32_1 = arith.constant 0 : i32
    return %c0_i32, %c0_i32_0 : i32, i32
  }
  func.func @transform_4(%arg0: i32) -> (i32, i32, i32) {
    %c0_i32 = arith.constant 0 : i32
    %c0_i32_0 = arith.constant 0 : i32
    %c0_i32_1 = arith.constant 0 : i32
    %c0_i32_2 = arith.constant 0 : i32
    return %c0_i32, %c0_i32_0, %c0_i32_1 : i32, i32, i32
  }
  func.func @transform_5(%arg0: i32) -> (i32, i32) {
    %c0_i32 = arith.constant 0 : i32
    %c0_i32_0 = arith.constant 0 : i32
    %c0_i32_1 = arith.constant 0 : i32
    return %c0_i32, %c0_i32_0 : i32, i32
  }
  func.func @transform_6(%arg0: i32) -> (i32, i32, i32) {
    %c0_i32 = arith.constant 0 : i32
    %c0_i32_0 = arith.constant 0 : i32
    %c0_i32_1 = arith.constant 0 : i32
    %c0_i32_2 = arith.constant 0 : i32
    return %c0_i32, %c0_i32_0, %c0_i32_1 : i32, i32, i32
  }
  func.func @transform_7(%arg0: i32) -> (i32, i32) {
    %c0_i32 = arith.constant 0 : i32
    %c0_i32_0 = arith.constant 0 : i32
    %c0_i32_1 = arith.constant 0 : i32
    return %c0_i32, %c0_i32_0 : i32, i32
  }
  func.func @transform_8(%arg0: i32) -> (i32, i32, i32) {
    %c0_i32 = arith.constant 0 : i32
    %c0_i32_0 = arith.constant 0 : i32
    %c0_i32_1 = arith.constant 0 : i32
    %c0_i32_2 = arith.constant 0 : i32
    return %c0_i32, %c0_i32_0, %c0_i32_1 : i32, i32, i32
  }
  func.func @transform_9(%arg0: i32) -> (i32, i32) {
    %c0_i32 = arith.constant 0 : i32
    %c0_i32_0 = arith.constant 0 : i32
    %c0_i32_1 = arith.constant 0 : i32
    return %c0_i32, %c0_i32_0 : i32, i32
  }
  func.func @transform_10(%arg0: i32) -> (i32, i32, i32) {
    %c0_i32 = arith.constant 0 : i32
    %c0_i32_0 = arith.constant 0 : i32
    %c0_i32_1 = arith.constant 0 : i32
    return %arg0, %c0_i32, %c0_i32_0 : i32, i32, i32
  }
}

</mosaic_0001>

<bundles_post_ra>
// kernel: tpu_custom_call.1
= control target key start
LH: loop header
LB: loop body
LE: loop exit
PB: predicated region body
PF: predicated region fallthrough
CT: control target
= control target key end

     0   :  { %15 = vsyncpa [#allocation4], 0  ;;  %s7994_s0 = inlined_call_operand.vmem [shape: f32[2,5,256], index: 0, kind: input, shape index: {}]   ;;  %s7995_s1 = inlined_call_operand.vmem [shape: f32[1,384], index: 1, kind: input, shape index: {}]   ;;  %s7996_s2 = inlined_call_operand.vmem [shape: f32[9,8,8], index: 2, kind: input, shape index: {}]   ;;  %s7997_s3 = inlined_call_operand.vmem [shape: f32[8,1], index: 3, kind: input, shape index: {}]   ;;  %s7998_s4 = inlined_call_operand.vmem [shape: f32[9,8,8], index: 4, kind: input, shape index: {}]   ;;  %s7999_s5 = inlined_call_operand.vmem [shape: f32[8,1], index: 5, kind: input, shape index: {}]   ;;  %s8000_s6 = inlined_call_operand.vmem [shape: f32[9,8,8], index: 6, kind: input, shape index: {}]   ;;  %s8001_s7 = inlined_call_operand.vmem [shape: f32[8,1], index: 7, kind: input, shape index: {}]   ;;  %s8002_s8 = inlined_call_operand.vmem [shape: f32[9,8,8], index: 8, kind: input, shape index: {}]   ;;  %s8003_s9 = inlined_call_operand.vmem [shape: f32[8,1], index: 9, kind: input, shape index: {}]   ;;  %s8004_s10 = inlined_call_operand.hbm [shape: f32[2,8,384], index: 10, kind: output, shape index: {}]  }
   0x1   :  { %17 = vsyncpa [#allocation4 + $0x1], 0  ;;  %s7079_s13 = smov 0   ;;  %s7081_s14 = smov 0  }
   0x2   :  { %s7083_s15 = smov 0   ;;  %s7085_s16 = smov 0  }
   0x3 LB: > { %s7100_s17 = sadd.s32 4294967295, %s6995_s16   ;;  %s6499_s18 = sadd.s32 4294967294, %s6995_s16   ;;  %s6995_s16 = sphi %s7085_s16, %s8016_s16   ;;  %s6991_s15 = sphi %s7083_s15, %s8015_s15   ;;  %s6987_s14 = sphi %s7081_s14, %s8014_s14   ;;  %s6983_s13 = sphi %s7079_s13, %s8013_s13  }
   0x4   : > { %s7104_s19 = sadd.s32 1, %s6995_s16   ;;  %s245_s20 = sadd.s32 1, %s6991_s15 }
   0x5   : > { %s242_s21 = ssub.s32 %s6995_s16, %s7104_s19  ;;  %p255_p0 = scmp.ne.s32.totalorder %s6991_s15, %s6987_s14 }
   0x6   : > { %p243_p1 = scmp.eq.s32.totalorder %s242_s21, 0  ;;  %p256_p2 = scmp.eq.s32.totalorder %s7100_s17, 1 }
   0x7   : > { %p261_p3 = scmp.ne.s32.totalorder %s6987_s14, %s6983_s13  ;;  %p262_p4 = scmp.eq.s32.totalorder %s6499_s18, 1 }
   0x8   : > { %s7115_s22 = scalar_select %p243_p1, %s6991_s15, %s245_s20  }
   0x9   : > { %p7117_p5 = por %p256_p2, %p255_p0  ;;  %p7121_p6 = por %p262_p4, %p261_p3 }
   0xa   : > { %p6502_p7 = scmp.ge.s32.totalorder %s6995_s16, 1  ;;  %p315_p8 = scmp.lt.s32.totalorder %s6995_s16, 3 }
   0xc   : > { %p316_p9 = pnand %p6502_p7, %p315_p8 }
   0xd   : > { %p353_p10 = scmp.lt.s32.totalorder (!%p316_p9), %s7100_s17, 1  ;;  %s6998_s30 = smov (!%p316_p9), 33  }
   0xe   : > { %319 = sbr.rel (%p316_p9) target bundleno = 1691 (0x69b), region = 60  ;;  %s6999_s11 = smov (!%p316_p9), 31  }
   0xf   : > { %s7000_s12 = smov (!%p316_p9), 21   ;;  %s7001_s18 = smov (!%p316_p9), 19  }
  0x10   : > { %s7002_s20 = smov (!%p316_p9), 23   ;;  %s7003_s21 = smov (!%p316_p9), 35  }
  0x11   : > { %s7006_s27 = smov (!%p316_p9), 27   ;;  %s7007_s28 = smov (!%p316_p9), 39  }
  0x13   : > { %v6997_v0 = vmov 0.0   ;;  %s354_s25 = scalar_select %p353_p10, %s7100_s17, 1  ;;  %vm412_vm0 = vcmask 118784   ;;  %vm419_vm1 = vcmask 266376   ;;  %vm368_vm2 = vcmask 282776   ;;  %v1951_v36 = vld [vmem:[%s7997_s3] sm:$0xff] }
  0x14   : > { %360 = vst [vmem:[#allocation2 + $0x10] sm:$0xff] %v6997_v0  ;;  %358 = vst [vmem:[#allocation2] sm:$0xff] %v6997_v0  ;;  %6685 = vmatprep.subr.mxu1 %v6997_v0  ;;  %574 = vmatprep.mubr.f32.mxu0 %v6997_v0  ;;  %vm375_vm3 = vcmask 430376   ;;  %vm382_vm4 = vcmask 577976   ;;  %vm426_vm5 = vcmask 413976   ;;  %vm389_vm6 = vcmask 725576  }
  0x15   : > { %359 = vst [vmem:[#allocation2 + $0x8] sm:$0xff] %v6997_v0  ;;  %361 = vst [vmem:[#allocation2 + $0x18] sm:$0xff] %v6997_v0  ;;  %s6612_s26 = sshll.u32 %s354_s25, 4  ;;  %s7004_s25 = smov 25   ;;  %vm433_vm7 = vcmask 561576   ;;  %vm396_vm8 = vcmask 873176  }
  0x16   : > { %s7138_s29 = scalar_lea.vmem %s7994_s0, %s6612_s26  ;;  %s7005_s26 = smov 37   ;;  %vm440_vm9 = vcmask 709176   ;;  %vm403_vm10 = vcmask 1020776   ;;  %vm447_vm11 = vcmask 856776   ;;  %vm410_vm12 = vcmask 1045496   ;;  %v6505_v54 = vld [vmem:[%s7996_s2 + $0x8] sm:$0xff] }
  0x17   : > { %v414_v1 = vld [vmem:[%s7138_s29] sm:$0x1f]  ;;  %v421_v6 = vld [vmem:[%s7138_s29 + $0x8] sm:$0x1f]  ;;  %vm454_vm13 = vcmask 1004376   ;;  %vm463_vm14 = vcmask 102400  }
  0x18   : > { %v405_v2 = vld [vmem:[%s7138_s29] sm:$0x1f]  ;;  %416 = vrot.lane.b32.xlu1 %v414_v1, %s6998_s30  ;;  %v428_v8 = vld [vmem:[%s7138_s29 + $0x8] sm:$0x1f]  ;;  %s7008_s30 = smov 29   ;;  %vm461_vm15 = vcmask 1045480  }
  0x19   : > { %407 = vrot.lane.b32.xlu0 %v405_v2, %s6999_s11  ;;  %v370_v3 = vld [vmem:[%s7138_s29] sm:$0x1f]  ;;  %v435_v10 = vld [vmem:[%s7138_s29 + $0x8] sm:$0x1f]  ;;  %s7009_s11 = smov 41   ;;  %v7022_v37 = vmov 0  }
  0x1a   : > { %v363_v4 = vld [vmem:[%s7138_s29] sm:$0x1f]  ;;  %v442_v12 = vld [vmem:[%s7138_s29 + $0x8] sm:$0x1f]  ;;  %6932 = vset.pattern.permute.xlu0 %v7022_v37  ;;  %6933 = vset.pattern.permute.xlu1 %v7022_v37  ;;  %v6510_v2 = vld [vmem:[%s7996_s2 + $0x10] sm:$0xff] }
  0x1b   : > { %v377_v5 = vld [vmem:[%s7138_s29] sm:$0x1f]  ;;  %v449_v13 = vld [vmem:[%s7138_s29 + $0x8] sm:$0x1f] }
  0x1c   : > { %372 = vrot.lane.b32.xlu1 %v370_v3, %s7000_s12  ;;  %v384_v7 = vld [vmem:[%s7138_s29] sm:$0x1f]  ;;  %v456_v14 = vld [vmem:[%s7138_s29 + $0x8] sm:$0x1f]  ;;  %s7010_s12 = smov 43  }
  0x1d   : > { %365 = vrot.lane.b32.xlu0 %v363_v4, %s7001_s18  ;;  %v391_v9 = vld [vmem:[%s7138_s29] sm:$0x1f]  ;;  %v465_v15 = vld [vmem:[%s7138_s29 + $0x8] sm:$0x1f] }
  0x1e   : > { %v398_v11 = vld [vmem:[%s7138_s29] sm:$0x1f]  ;;  %v472_v16 = vld [vmem:[%s7138_s29 + $0x8] sm:$0x1f]  ;;  %s7018_s29 = smov 127  }
  0x1f   : > { %v484_v61 = vld [vmem:[%s7996_s2] sm:$0xff] }
  0x20   : > { %379 = vrot.lane.b32.xlu1 %v377_v5, %s7002_s20  ;;  %s7011_s20 = smov 45  }
  0x21   : > { %423 = vrot.lane.b32.xlu0 %v421_v6, %s7003_s21  ;;  %s7012_s21 = smov 47  }
  0x24   : > { %386 = vrot.lane.b32.xlu1 %v384_v7, %s7004_s25  ;;  %s7013_s25 = smov 49  }
  0x25   : > { %430 = vrot.lane.b32.xlu0 %v428_v8, %s7005_s26  ;;  %s7014_s26 = smov 18  }
  0x28   : > { %393 = vrot.lane.b32.xlu1 %v391_v9, %s7006_s27  ;;  %s7015_s27 = smov 17  }
  0x29   : > { %437 = vrot.lane.b32.xlu0 %v435_v10, %s7007_s28  ;;  %s7016_s28 = smov 1   ;;  %v6513_v10 = vld [vmem:[%s7996_s2 + $0x18] sm:$0xff] }
  0x2c   : > { %400 = vrot.lane.b32.xlu1 %v398_v11, %s7008_s30  ;;  %s7019_s30 = smov 111  }
  0x2d   : > { %444 = vrot.lane.b32.xlu0 %v442_v12, %s7009_s11  ;;  %s8007_s11 = smov 110  }
  0x30   : > { %458 = vrot.lane.b32.xlu1 %v456_v14, %s7011_s20  ;;  %s350_s20 = sand.u32 1, %s6987_s14  }
  0x31   : > { %451 = vrot.lane.b32.xlu0 %v449_v13, %s7010_s12  ;;  %s8005_s12 = smov 109   ;;  %v6516_v13 = vld [vmem:[%s7996_s2 + $0x20] sm:$0xff] }
  0x34   : > { %474 = vrot.lane.b32.xlu1 %v472_v16, %s7013_s25 }
  0x35   : > { %467 = vrot.lane.b32.xlu0 %v465_v15, %s7012_s21  ;;  %s7023_s21 = smov [#allocation3]  }
  0x36   : > { %s6939_s25 = sshll.u32 %s7023_s21, 4  ;;  %s6940_s25 = int_to_ptr.vmem [resolvable:$false] %s6939_s25 }
  0x38   : > { %651 = vrot.lane.b32.xlu1 %v6997_v0, %s7001_s18 }
  0x39   : > { %491 = vrot.lane.b32.xlu0 %v6997_v0, %s7014_s26 }
  0x3d   : > { %812 = vrot.lane.b32.xlu0 %v6997_v0, %s7015_s27 }
  0x41   : > { %976 = vrot.lane.b32.xlu0 %v6997_v0, %s7016_s28 }
  0x8a   : > { %v417_v17 = vpop.permute.xlu1 %416 }
  0x8b   : > { %v408_v18 = vpop.permute.xlu0 %407 }
  0x8c   : > { %413 = vst.msk [vmem:[#allocation2 + $0x10] sm:$0x1f] %vm412_vm0, %v408_v18  ;;  %vm470_vm0 = vcmask 249976  }
  0x8d   : > { %420 = vst.msk [vmem:[#allocation2 + $0x10] sm:$0x1f] %vm419_vm1, %v417_v17  ;;  %vm477_vm1 = vcmask 397576  }
  0x8e   : > { %v373_v19 = vpop.permute.xlu1 %372 }
  0x8f   : > { %v366_v20 = vpop.permute.xlu0 %365 }
  0x90   : > { %369 = vst.msk [vmem:[#allocation2 + $0x8] sm:$0x1f] %vm368_vm2, %v366_v20  ;;  %vm7017_vm2 = vmmov 0  }
  0x91   : > { %376 = vst.msk [vmem:[#allocation2 + $0x8] sm:$0x1f] %vm375_vm3, %v373_v19  ;;  %6687 = vmatprep.mubr.msk.f32.mxu1 %vm7017_vm2, %v6997_v0  ;;  %vm499_vm3 = vcmask 146432  }
  0x92   : > { %v380_v21 = vpop.permute.xlu1 %379 }
  0x93   : > { %v424_v22 = vpop.permute.xlu0 %423  ;;  %383 = vst.msk [vmem:[#allocation2 + $0x8] sm:$0x1f] %vm382_vm4, %v380_v21  ;;  %vm506_vm4 = vcmask 64512  }
  0x94   : > { %427 = vst.msk [vmem:[#allocation2 + $0x10] sm:$0x1f] %vm426_vm5, %v424_v22  ;;  %vm659_vm5 = vcmask 154624  }
  0x96   : > { %v387_v23 = vpop.permute.xlu1 %386 }
  0x97   : > { %v431_v24 = vpop.permute.xlu0 %430  ;;  %390 = vst.msk [vmem:[#allocation2 + $0x8] sm:$0x1f] %vm389_vm6, %v387_v23  ;;  %vm820_vm6 = vcmask 138240   ;;  %v6522_v23 = vld [vmem:[%s7996_s2 + $0x30] sm:$0xff] }
  0x98   : > { %434 = vst.msk [vmem:[#allocation2 + $0x10] sm:$0x1f] %vm433_vm7, %v431_v24  ;;  %vm984_vm7 = vcmask 7168  }
  0x9a   : > { %v394_v25 = vpop.permute.xlu1 %393 }
  0x9b   : > { %v438_v26 = vpop.permute.xlu0 %437  ;;  %397 = vst.msk [vmem:[#allocation2 + $0x8] sm:$0x1f] %vm396_vm8, %v394_v25  ;;  %vm1305_vm8 = vcmask 1039360  }
  0x9c   : > { %441 = vst.msk [vmem:[#allocation2 + $0x10] sm:$0x1f] %vm440_vm9, %v438_v26  ;;  %vm1469_vm9 = vcmask 908288  }
  0x9e   : > { %v401_v27 = vpop.permute.xlu1 %400 }
  0x9f   : > { %v445_v28 = vpop.permute.xlu0 %444  ;;  %404 = vst.msk [vmem:[#allocation2 + $0x8] sm:$0x1f] %vm403_vm10, %v401_v27  ;;  %vm1633_vm10 = vcmask 900096  }
  0xa0   : > { %448 = vst.msk [vmem:[#allocation2 + $0x10] sm:$0x1f] %vm447_vm11, %v445_v28  ;;  %v6525_v28 = vld [vmem:[%s7996_s2 + $0x38] sm:$0xff]  ;;  %vm1797_vm11 = vcmask 891904  }
  0xa1   : > { %411 = vst.msk [vmem:[#allocation2 + $0x8] sm:$0x1f] %vm410_vm12, %v408_v18  ;;  %v6519_v18 = vld [vmem:[%s7996_s2 + $0x28] sm:$0xff] }
  0xa2   : > { %v459_v30 = vpop.permute.xlu1 %458 }
  0xa3   : > { %v452_v29 = vpop.permute.xlu0 %451  ;;  %464 = vst.msk [vmem:[#allocation2 + $0x18] sm:$0x1f] %vm463_vm14, %v459_v30 }
  0xa4   : > { %455 = vst.msk [vmem:[#allocation2 + $0x10] sm:$0x1f] %vm454_vm13, %v452_v29 }
  0xa5   : > { %462 = vst.msk [vmem:[#allocation2 + $0x10] sm:$0x1f] %vm461_vm15, %v459_v30 }
  0xa6   : > { %v475_v32 = vpop.permute.xlu1 %474 }
  0xa7   : > { %v468_v31 = vpop.permute.xlu0 %467 }
  0xa8   : > { %471 = vst.msk [vmem:[#allocation2 + $0x18] sm:$0x1f] %vm470_vm0, %v468_v31  ;;  %v7165_v33 = vld [vmem:[#allocation2 + $0x8] sm:$0xff] }
  0xa9   : > { %478 = vst.msk [vmem:[#allocation2 + $0x18] sm:$0x1f] %vm477_vm1, %v475_v32  ;;  %493 = vrot.lane.b32.xlu0 %v7165_v33, %s7014_s26  ;;  %v6528_v32 = vld [vmem:[%s7996_s2 + $0x40] sm:$0xff] }
  0xaa   : > { %v652_v42 = vpop.permute.xlu1 %651 }
  0xab   : > { %v492_v38 = vpop.permute.xlu0 %491 }
  0xac   : > { %v7179_v35 = vld [vmem:[#allocation2 + $0x10] sm:$0xff] }
  0xad   : > { %814 = vrot.lane.b32.xlu0 %v7165_v33, %s7015_s27 }
  0xaf   : > { %v813_v39 = vpop.permute.xlu0 %812 }
  0xb0   : > { %v7171_v34 = vld [vmem:[#allocation2 + $0x18] sm:$0xff] }
  0xb1   : > { %978 = vrot.lane.b32.xlu0 %v7165_v33, %s7016_s28  ;;  %497 = vrot.lane.b32.xlu1 %v7171_v34, %s7014_s26 }
  0xb3   : > { %v7240_v40 = vpop.permute.xlu0 %976 }
  0xb5   : > { %655 = vrot.lane.b32.xlu0 %v7179_v35, %s7001_s18  ;;  %657 = vrot.lane.b32.xlu1 %v7171_v34, %s7001_s18 }
  0xb9   : > { %818 = vrot.lane.b32.xlu0 %v7171_v34, %s7015_s27  ;;  %653 = vrot.lane.b32.xlu1 %v7165_v33, %s7001_s18 }
  0xbd   : > { %1301 = vrot.lane.b32.xlu0 %v7171_v34, %s7018_s29  ;;  %495 = vrot.lane.b32.xlu1 %v7179_v35, %s7014_s26 }
  0xc1   : > { %982 = vrot.lane.b32.xlu0 %v7171_v34, %s7016_s28  ;;  %1297 = vrot.lane.b32.xlu1 %v7165_v33, %s7018_s29 }
  0xc5   : > { %1465 = vrot.lane.b32.xlu0 %v7171_v34, %s7019_s30  ;;  %1461 = vrot.lane.b32.xlu1 %v7165_v33, %s7019_s30 }
  0xc9   : > { %1625 = vrot.lane.b32.xlu0 %v7165_v33, %s8007_s11  ;;  %816 = vrot.lane.b32.xlu1 %v7179_v35, %s7015_s27 }
  0xcd   : > { %1627 = vrot.lane.b32.xlu0 %v7179_v35, %s8007_s11  ;;  %980 = vrot.lane.b32.xlu1 %v7179_v35, %s7016_s28 }
  0xd1   : > { %1791 = vrot.lane.b32.xlu0 %v7179_v35, %s8005_s12  ;;  %1629 = vrot.lane.b32.xlu1 %v7171_v34, %s8007_s11 }
  0xd5   : > { %1789 = vrot.lane.b32.xlu0 %v7165_v33, %s8005_s12  ;;  %1299 = vrot.lane.b32.xlu1 %v7179_v35, %s7018_s29 }
  0xd9   : > { %1631 = vrot.lane.b32.xlu0 %v6997_v0, %s8007_s11  ;;  %1463 = vrot.lane.b32.xlu1 %v7179_v35, %s7019_s30 }
  0xdd   : > { %1303 = vrot.lane.b32.xlu1 %v6997_v0, %s7018_s29  ;;  %1954 = vperm.xlu0 %6932, %v1951_v36  }
  0xe1   : > { %1793 = vrot.lane.b32.xlu1 %v7171_v34, %s8005_s12  ;;  %2002 = vrot.lane.b32.xlu0 %v6997_v0, %s7014_s26 }
  0xe5   : > { %1467 = vrot.lane.b32.xlu1 %v6997_v0, %s7019_s30 }
  0xe9   : > { %1795 = vrot.lane.b32.xlu1 %v6997_v0, %s8005_s12 }
  0xed   : > { %2160 = vrot.lane.b32.xlu1 %v6997_v0, %s7001_s18 }
  0xf1   : > { %2320 = vrot.lane.b32.xlu1 %v6997_v0, %s7015_s27 }
  0xf5   : > { %2483 = vrot.lane.b32.xlu1 %v6997_v0, %s7016_s28 }
 0x11b   : > { %v494_v41 = vpop.permute.xlu0 %493 }
 0x11c   : > { %v500_v55 = vsel %vm499_vm3, %v492_v38, %v494_v41 }
 0x11f   : > { %v815_v43 = vpop.permute.xlu0 %814 }
 0x120   : > { %v821_v5 = vsel %vm820_vm6, %v813_v39, %v815_v43 }
 0x123   : > { %v498_v44 = vpop.permute.xlu1 %497  ;;  %v979_v45 = vpop.permute.xlu0 %978 }
 0x124   : > { %v985_v11 = vsel %vm984_vm7, %v7240_v40, %v979_v45 }
 0x127   : > { %v658_v46 = vpop.permute.xlu1 %657  ;;  %v656_v47 = vpop.permute.xlu0 %655 }
 0x128   : > { %v662_v58 = vsel %vm659_vm5, %v656_v47, %v658_v46 }
 0x12b   : > { %v654_v48 = vpop.permute.xlu1 %653  ;;  %v819_v49 = vpop.permute.xlu0 %818 }
 0x12c   : > { %v661_v56 = vsel %vm659_vm5, %v654_v48, %v656_v47  ;;  %v660_v60 = vsel %vm659_vm5, %v652_v42, %v654_v48 }
 0x12f   : > { %v496_v50 = vpop.permute.xlu1 %495  ;;  %v7242_v51 = vpop.permute.xlu0 %1301 }
 0x130   : > { %v501_v52 = vsel %vm499_vm3, %v494_v41, %v496_v50  ;;  %v502_v53 = vsel %vm499_vm3, %v496_v50, %v498_v44 }
 0x131   : > { %540 = vmatprep.subr.mxu0 %v501_v52  ;;  %6686 = vmatpush3.msra.mxu1 %v502_v53 }
 0x132   : > { %541 = vmatpush1.msra.mxu0 %v500_v55  ;;  %6690 = vmatprep.subr.mxu1 %v6997_v0 }
 0x133   : > { %6688 = vmatmul.mubr.msk.f32.vlgmr.msra.gmra.mxu1 %vm506_vm4, %v6505_v54  ;;  %v1298_v57 = vpop.permute.xlu1 %1297  ;;  %699 = vmatprep.subr.mxu0 %v661_v56  ;;  %v983_v59 = vpop.permute.xlu0 %982 }
 0x134   : > { %6691 = vmatpush3.msra.mxu1 %v662_v58  ;;  %6506 = vmatmul.mubr.msk.f32.vlgmr.msra.gmra.mxu0 %vm506_vm4, %v6505_v54 }
 0x135   : > { %700 = vmatpush1.msra.mxu0 %v660_v60  ;;  %733 = vmatprep.mubr.f32.mxu0 %v6997_v0 }
 0x136   : > { %6692 = vmatprep.mubr.msk.f32.mxu1 %vm7017_vm2, %v6997_v0  ;;  %6695 = vmatprep.subr.mxu1 %v6997_v0 }
 0x137   : > { %v1462_v62 = vpop.permute.xlu1 %1461  ;;  %6693 = vmatmul.mubr.msk.f32.vlgmr.msra.gmra.mxu1 %vm506_vm4, %v484_v61  ;;  %v7267_v63 = vpop.permute.xlu0 %1465 }
 0x138   : > { %6508 = vmatmul.mubr.msk.f32.vlgmr.msra.gmra.mxu0 %vm506_vm4, %v484_v61  ;;  %6697 = vmatprep.mubr.msk.f32.mxu1 %vm7017_vm2, %v6997_v0 }
 0x139   : > { %894 = vmatprep.mubr.f32.mxu0 %v6997_v0 }
 0x13b   : > { %v817_v1 = vpop.permute.xlu1 %816  ;;  %v1626_v6 = vpop.permute.xlu0 %1625 }
 0x13c   : > { %v822_v3 = vsel %vm820_vm6, %v815_v43, %v817_v1  ;;  %v823_v4 = vsel %vm820_vm6, %v817_v1, %v819_v49 }
 0x13d   : > { %860 = vmatprep.subr.mxu0 %v822_v3  ;;  %6696 = vmatpush3.msra.mxu1 %v823_v4 }
 0x13e   : > { %861 = vmatpush1.msra.mxu0 %v821_v5  ;;  %6698 = vmatmul.mubr.msk.f32.vlgmr.msra.gmra.mxu1 %vm506_vm4, %v6510_v2 }
 0x13f   : > { %v981_v7 = vpop.permute.xlu1 %980  ;;  %6511 = vmatmul.mubr.msk.f32.vlgmr.msra.gmra.mxu0 %vm506_vm4, %v6510_v2  ;;  %6700 = vmatprep.subr.mxu1 %v6997_v0  ;;  %v1628_v14 = vpop.permute.xlu0 %1627 }
 0x140   : > { %v986_v8 = vsel %vm984_vm7, %v979_v45, %v981_v7  ;;  %v987_v9 = vsel %vm984_vm7, %v981_v7, %v983_v59  ;;  %1058 = vmatprep.mubr.f32.mxu0 %v6997_v0  ;;  %6702 = vmatprep.mubr.msk.f32.mxu1 %vm7017_vm2, %v6997_v0  ;;  %v1634_v26 = vsel %vm1633_vm10, %v1626_v6, %v1628_v14 }
 0x141   : > { %1024 = vmatprep.subr.mxu0 %v986_v8  ;;  %6701 = vmatpush3.msra.mxu1 %v987_v9 }
 0x142   : > { %1025 = vmatpush1.msra.mxu0 %v985_v11  ;;  %6705 = vmatprep.subr.mxu1 %v6997_v0 }
 0x143   : > { %v7290_v12 = vpop.permute.xlu1 %1629  ;;  %6514 = vmatmul.mubr.msk.f32.vlgmr.msra.gmra.mxu0 %vm506_vm4, %v6513_v10  ;;  %6703 = vmatmul.mubr.msk.f32.vlgmr.msra.gmra.mxu1 %vm506_vm4, %v6513_v10  ;;  %v1792_v19 = vpop.permute.xlu0 %1791  ;;  %v1970_v10 = vlaneseq }
 0x144   : > { %1173 = vmatprep.subr.mxu0 %v7179_v35  ;;  %6706 = vmatpush3.msra.mxu1 %v7171_v34  ;;  %v1635_v24 = vsel %vm1633_vm10, %v1628_v14, %v7290_v12 }
 0x145   : > { %1174 = vmatpush1.msra.mxu0 %v7165_v33  ;;  %1207 = vmatprep.mubr.f32.mxu0 %v6997_v0 }
 0x146   : > { %6707 = vmatprep.mubr.msk.f32.mxu1 %vm7017_vm2, %v6997_v0  ;;  %6710 = vmatprep.subr.mxu1 %v6997_v0 }
 0x147   : > { %v1300_v15 = vpop.permute.xlu1 %1299  ;;  %6517 = vmatmul.mubr.msk.f32.vlgmr.msra.gmra.mxu0 %vm506_vm4, %v6516_v13  ;;  %6708 = vmatmul.mubr.msk.f32.vlgmr.msra.gmra.mxu1 %vm506_vm4, %v6516_v13  ;;  %v1790_v29 = vpop.permute.xlu0 %1789 }
 0x148   : > { %v1307_v16 = vsel %vm1305_vm8, %v1300_v15, %v7242_v51  ;;  %v1306_v17 = vsel %vm1305_vm8, %v1298_v57, %v1300_v15  ;;  %1379 = vmatprep.mubr.f32.mxu0 %v6997_v0  ;;  %6712 = vmatprep.mubr.msk.f32.mxu1 %vm7017_vm2, %v6997_v0  ;;  %v1798_v33 = vsel %vm1797_vm11, %v1790_v29, %v1792_v19 }
 0x149   : > { %1345 = vmatprep.subr.mxu0 %v1307_v16 }
 0x14a   : > { %1346 = vmatpush1.msra.mxu0 %v1306_v17  ;;  %v1971_v17 = vshrl.u32 %v1970_v10, 7 }
 0x14b   : > { %v1464_v20 = vpop.permute.xlu1 %1463  ;;  %6520 = vmatmul.mubr.msk.f32.vlgmr.msra.gmra.mxu0 %vm506_vm4, %v6519_v18  ;;  %v1632_v34 = vpop.permute.xlu0 %1631 }
 0x14c   : > { %v1471_v21 = vsel %vm1469_vm9, %v1464_v20, %v7267_v63  ;;  %v1470_v22 = vsel %vm1469_vm9, %v1462_v62, %v1464_v20  ;;  %1543 = vmatprep.mubr.f32.mxu0 %v6997_v0  ;;  %v1636_v37 = vsel %vm1633_vm10, %v7290_v12, %v1632_v34 }
 0x14d   : > { %1509 = vmatprep.subr.mxu0 %v1471_v21 }
 0x14e   : > { %1510 = vmatpush1.msra.mxu0 %v1470_v22 }
 0x14f   : > { %v1304_v25 = vpop.permute.xlu1 %1303  ;;  %6523 = vmatmul.mubr.msk.f32.vlgmr.msra.gmra.mxu0 %vm506_vm4, %v6522_v23  ;;  %1673 = vmatprep.subr.mxu0 %v1635_v24  ;;  %v1972_v24 = vsub.s32 0, %v1971_v17 }
 0x150   : > { %v1308_v27 = vsel %vm1305_vm8, %v7242_v51, %v1304_v25  ;;  %1674 = vmatpush1.msra.mxu0 %v1634_v26  ;;  %1707 = vmatprep.mubr.f32.mxu0 %v6997_v0 }
 0x151   : > { %6711 = vmatpush3.msra.mxu1 %v1308_v27 }
 0x152   : > { %6713 = vmatmul.mubr.msk.f32.vlgmr.msra.gmra.mxu1 %vm506_vm4, %v6519_v18  ;;  %6715 = vmatprep.subr.mxu1 %v6997_v0 }
 0x153   : > { %v1794_v30 = vpop.permute.xlu1 %1793  ;;  %6526 = vmatmul.mubr.msk.f32.vlgmr.msra.gmra.mxu0 %vm506_vm4, %v6525_v28  ;;  %6717 = vmatprep.mubr.msk.f32.mxu1 %vm7017_vm2, %v6997_v0 }
 0x154   : > { %v1799_v31 = vsel %vm1797_vm11, %v1792_v19, %v1794_v30  ;;  %1871 = vmatprep.mubr.f32.mxu0 %v6997_v0 }
 0x155   : > { %1837 = vmatprep.subr.mxu0 %v1799_v31 }
 0x156   : > { %1838 = vmatpush1.msra.mxu0 %v1798_v33 }
 0x157   : > { %v1468_v35 = vpop.permute.xlu1 %1467  ;;  %6529 = vmatmul.mubr.msk.f32.vlgmr.msra.gmra.mxu0 %vm506_vm4, %v6528_v32 }
 0x158   : > { %v1472_v36 = vsel %vm1469_vm9, %v7267_v63, %v1468_v35  ;;  %2083 = vmatprep.mubr.f32.mxu0 %v6997_v0  ;;  %v1955_v25 = vpop.permute.xlu0 %1954 }
 0x159   : > { %6716 = vmatpush3.msra.mxu1 %v1472_v36 }
 0x15a   : > { %6718 = vmatmul.mubr.msk.f32.vlgmr.msra.gmra.mxu1 %vm506_vm4, %v6522_v23  ;;  %6720 = vmatprep.subr.mxu1 %v6997_v0 }
 0x15b   : > { %v1796_v38 = vpop.permute.xlu1 %1795  ;;  %6721 = vmatpush3.msra.mxu1 %v1636_v37  ;;  %6722 = vmatprep.mubr.msk.f32.mxu1 %vm7017_vm2, %v6997_v0 }
 0x15c   : > { %v1800_v39 = vsel %vm1797_vm11, %v1794_v30, %v1796_v38  ;;  %6725 = vmatprep.subr.mxu1 %v6997_v0 }
 0x15e   : > { %6723 = vmatmul.mubr.msk.f32.vlgmr.msra.gmra.mxu1 %vm506_vm4, %v6525_v28  ;;  %v479_v28 = vld [vmem:[%s7995_s1] sm:$0x7] }
 0x15f   : > { %6726 = vmatpush3.msra.mxu1 %v1800_v39  ;;  %6727 = vmatprep.mubr.msk.f32.mxu1 %vm7017_vm2, %v6997_v0  ;;  %v7366_v34 = vrot.slane %v479_v28, %v1972_v24 }
 0x160   : > { %6730 = vmatprep.subr.mxu1 %v6997_v0 }
 0x162   : > { %6728 = vmatmul.mubr.msk.f32.vlgmr.msra.gmra.mxu1 %vm506_vm4, %v6528_v32 }
 0x163   : > { %6732 = vmatprep.mubr.msk.f32.mxu1 %vm7017_vm2, %v6997_v0 }
 0x1f3   : > { %v647_v40 = vpop.f32.mrf.mxu1 }
 0x1f4   : > { %v576_v41 = vpop.f32.mrf.mxu0 }
 0x1f5   : > { %v6689_v42 = vpop.f32.mrf.mxu1 }
 0x1f6   : > { %v578_v43 = vpop.f32.mrf.mxu0 }
 0x1f7   : > { %v806_v44 = vpop.f32.mrf.mxu1 }
 0x1f8   : > { %v735_v45 = vpop.f32.mrf.mxu0  ;;  %v807_v8 = vadd.f32 %v806_v44, %v647_v40 }
 0x1f9   : > { %v6694_v46 = vpop.f32.mrf.mxu1  ;;  %v736_v48 = vadd.f32 %v735_v45, %v576_v41  ;;  %v1976_v41 = vsub.s32 1, %v1971_v17 }
 0x1fa   : > { %v737_v47 = vpop.f32.mrf.mxu0 }
 0x1fb   : > { %v738_v53 = vadd.f32 %v737_v47, %v578_v43 }
 0x1fe   : > { %v967_v49 = vpop.f32.mrf.mxu1 }
 0x1ff   : > { %v896_v50 = vpop.f32.mrf.mxu0  ;;  %v973_v15 = vadd.f32 %v967_v49, %v807_v8  ;;  %v7373_v49 = vrot.slane %v479_v28, %v1976_v41 }
 0x200   : > { %v6699_v51 = vpop.f32.mrf.mxu1  ;;  %v971_v54 = vadd.f32 %v896_v50, %v736_v48  ;;  %v1980_v48 = vsub.s32 2, %v1971_v17  ;;  %v1995_v17 = vld [vmem:[%s7998_s4] sm:$0xff] }
 0x201   : > { %v898_v52 = vpop.f32.mrf.mxu0 }
 0x202   : > { %v972_v59 = vadd.f32 %v898_v52, %v738_v53 }
 0x203   : > { %v1060_v55 = vpop.f32.mrf.mxu0  ;;  %v1131_v56 = vpop.f32.mrf.mxu1 }
 0x204   : > { %v1135_v60 = vadd.f32 %v1060_v55, %v971_v54  ;;  %v1137_v22 = vadd.f32 %v1131_v56, %v973_v15  ;;  %v7377_v54 = vrot.slane %v479_v28, %v1980_v48 }
 0x205   : > { %v1062_v57 = vpop.f32.mrf.mxu0  ;;  %v6704_v58 = vpop.f32.mrf.mxu1 }
 0x206   : > { %v1136_v2 = vadd.f32 %v1062_v57, %v972_v59  ;;  %v3453_v59 = vld [vmem:[%s7999_s5] sm:$0xff] }
 0x207   : > { %v1209_v61 = vpop.f32.mrf.mxu0  ;;  %v1280_v62 = vpop.f32.mrf.mxu1 }
 0x208   : > { %v1284_v3 = vadd.f32 %v1209_v61, %v1135_v60  ;;  %v1286_v33 = vadd.f32 %v1280_v62, %v1137_v22  ;;  %v2161_v60 = vpop.permute.xlu1 %2160 }
 0x209   : > { %v1211_v63 = vpop.f32.mrf.mxu0  ;;  %v6709_v1 = vpop.f32.mrf.mxu1 }
 0x20a   : > { %v1285_v6 = vadd.f32 %v1211_v63, %v1136_v2  ;;  %v2003_v2 = vpop.permute.xlu0 %2002 }
 0x20b   : > { %v1381_v4 = vpop.f32.mrf.mxu0 }
 0x20c   : > { %v1456_v7 = vadd.f32 %v1381_v4, %v1284_v3  ;;  %v2321_v61 = vpop.permute.xlu1 %2320 }
 0x20d   : > { %v1383_v5 = vpop.f32.mrf.mxu0 }
 0x20e   : > { %v1457_v12 = vadd.f32 %v1383_v5, %v1285_v6  ;;  %v6531_v5 = vld [vmem:[%s7998_s4 + $0x8] sm:$0xff] }
 0x20f   : > { %v1545_v9 = vpop.f32.mrf.mxu0 }
 0x210   : > { %v1620_v13 = vadd.f32 %v1545_v9, %v1456_v7  ;;  %v2484_v62 = vpop.permute.xlu1 %2483 }
 0x211   : > { %v1547_v11 = vpop.f32.mrf.mxu0 }
 0x212   : > { %v1452_v14 = vpop.f32.mrf.mxu1  ;;  %v1621_v20 = vadd.f32 %v1547_v11, %v1457_v12 }
 0x213   : > { %v1709_v16 = vpop.f32.mrf.mxu0  ;;  %v1458_v38 = vadd.f32 %v1452_v14, %v1286_v33 }
 0x214   : > { %v6714_v18 = vpop.f32.mrf.mxu1  ;;  %v1784_v21 = vadd.f32 %v1709_v16, %v1620_v13 }
 0x215   : > { %v1711_v19 = vpop.f32.mrf.mxu0 }
 0x216   : > { %v1785_v26 = vadd.f32 %v1711_v19, %v1621_v20 }
 0x217   : > { %v1873_v23 = vpop.f32.mrf.mxu0 }
 0x218   : > { %v1948_v27 = vadd.f32 %v1873_v23, %v1784_v21 }
 0x219   : > { %v1875_v29 = vpop.f32.mrf.mxu0 }
 0x21a   : > { %v1949_v30 = vadd.f32 %v1875_v29, %v1785_v26  ;;  %v1957_v31 = vadd.f32 %v1955_v25, %v1948_v27  ;;  %v1616_v32 = vpop.f32.mrf.mxu1  ;;  %v6536_v27 = vld [vmem:[%s7998_s4 + $0x10] sm:$0xff] }
 0x21b   : > { %v1622_v43 = vadd.f32 %v1616_v32, %v1458_v38  ;;  %v6539_v32 = vld [vmem:[%s7998_s4 + $0x18] sm:$0xff] }
 0x21c   : > { %v1958_v35 = vadd.f32 %v1955_v25, %v1949_v30  ;;  %vm1960_vm12 = vcmp.gt.f32.partialorder %v1957_v31, 0.0  ;;  %v1963_v36 = vmul.f32 0.01, %v1957_v31  ;;  %v6719_v37 = vpop.f32.mrf.mxu1 }
 0x21e   : > { %v1966_v39 = vsel %vm1960_vm12, %v1957_v31, %v1963_v36  ;;  %v1780_v40 = vpop.f32.mrf.mxu1  ;;  %v1964_v44 = vmul.f32 0.01, %v1958_v35  ;;  %vm1961_vm13 = vcmp.gt.f32.partialorder %v1958_v35, 0.0  ;;  %v6542_v36 = vld [vmem:[%s7998_s4 + $0x20] sm:$0xff] }
 0x21f   : > { %v7369_v42 = vmul.f32 %v7366_v34, %v1966_v39  ;;  %v1786_v46 = vadd.f32 %v1780_v40, %v1622_v43 }
 0x220   : > { %v6724_v45 = vpop.f32.mrf.mxu1  ;;  %v1967_v51 = vsel %vm1961_vm13, %v1958_v35, %v1964_v44 }
 0x221   : > { %2004 = vrot.lane.b32.xlu1 %v7369_v42, %s7014_s26  ;;  %v7380_v55 = vmul.f32 %v7373_v49, %v1967_v51 }
 0x222   : > { %v1944_v47 = vpop.f32.mrf.mxu1 }
 0x223   : > { %v1950_v50 = vadd.f32 %v1944_v47, %v1786_v46  ;;  %v7524_v47 = vld [vmem:[#allocation2] sm:$0xff] }
 0x224   : > { %v6729_v52 = vpop.f32.mrf.mxu1 }
 0x225   : > { %v1959_v53 = vadd.f32 %v1955_v25, %v1950_v50  ;;  %2162 = vrot.lane.b32.xlu1 %v7369_v42, %s7001_s18  ;;  %v6551_v52 = vld [vmem:[%s7998_s4 + $0x38] sm:$0xff] }
 0x227   : > { %vm1962_vm14 = vcmp.gt.f32.partialorder %v1959_v53, 0.0  ;;  %v1965_v56 = vmul.f32 0.01, %v1959_v53 }
 0x229   : > { %v1968_v57 = vsel %vm1962_vm14, %v1959_v53, %v1965_v56  ;;  %2006 = vrot.lane.b32.xlu1 %v7380_v55, %s7014_s26 }
 0x22a   : > { %v7385_v58 = vmul.f32 %v7377_v54, %v1968_v57 }
 0x22c   : > { %2008 = vrot.lane.b32.xlu0 %v7385_v58, %s7014_s26 }
 0x22d   : > { %2489 = vrot.lane.b32.xlu1 %v7385_v58, %s7016_s28 }
 0x230   : > { %2166 = vrot.lane.b32.xlu0 %v7385_v58, %s7001_s18 }
 0x231   : > { %2966 = vrot.lane.b32.xlu1 %v7369_v42, %s7019_s30 }
 0x234   : > { %2322 = vrot.lane.b32.xlu0 %v7369_v42, %s7015_s27 }
 0x235   : > { %2324 = vrot.lane.b32.xlu1 %v7380_v55, %s7015_s27 }
 0x238   : > { %2485 = vrot.lane.b32.xlu0 %v7369_v42, %s7016_s28 }
 0x239   : > { %2487 = vrot.lane.b32.xlu1 %v7380_v55, %s7016_s28 }
 0x23c   : > { %2164 = vrot.lane.b32.xlu0 %v7380_v55, %s7001_s18 }
 0x23d   : > { %3133 = vrot.lane.b32.xlu1 %v7385_v58, %s8007_s11 }
 0x240   : > { %2326 = vrot.lane.b32.xlu0 %v7385_v58, %s7015_s27 }
 0x241   : > { %2805 = vrot.lane.b32.xlu1 %v7380_v55, %s7018_s29 }
 0x244   : > { %2807 = vrot.lane.b32.xlu0 %v7385_v58, %s7018_s29 }
 0x245   : > { %2968 = vrot.lane.b32.xlu1 %v7380_v55, %s7019_s30 }
 0x248   : > { %2803 = vrot.lane.b32.xlu0 %v7369_v42, %s7018_s29 }
 0x249   : > { %3129 = vrot.lane.b32.xlu1 %v7369_v42, %s8007_s11 }
 0x24c   : > { %2970 = vrot.lane.b32.xlu0 %v7385_v58, %s7019_s30 }
 0x24d   : > { %3296 = vrot.lane.b32.xlu1 %v7385_v58, %s8005_s12 }
 0x250   : > { %2809 = vrot.lane.b32.xlu0 %v6997_v0, %s7018_s29 }
 0x251   : > { %3292 = vrot.lane.b32.xlu1 %v7369_v42, %s8005_s12 }
 0x254   : > { %3131 = vrot.lane.b32.xlu0 %v7380_v55, %s8007_s11 }
 0x255   : > { %3298 = vrot.lane.b32.xlu1 %v6997_v0, %s8005_s12 }
 0x258   : > { %3294 = vrot.lane.b32.xlu0 %v7380_v55, %s8005_s12  ;;  %s8011_s12 = smov 109  }
 0x259   : > { %3482 = vrot.lane.b32.xlu1 %v6997_v0, %s7014_s26 }
 0x25c   : > { %2972 = vrot.lane.b32.xlu0 %v6997_v0, %s7019_s30 }
 0x260   : > { %3135 = vrot.lane.b32.xlu0 %v6997_v0, %s8007_s11 }
 0x264   : > { %3456 = vperm.xlu0 %6932, %v3453_v59  }
 0x268   : > { %3640 = vrot.lane.b32.xlu0 %v6997_v0, %s7001_s18 }
 0x26c   : > { %3800 = vrot.lane.b32.xlu0 %v6997_v0, %s7015_s27 }
 0x293   : > { %v2005_v63 = vpop.permute.xlu1 %2004 }
 0x294   : > { %v2010_v6 = vsel %vm499_vm3, %v2003_v2, %v2005_v63 }
 0x297   : > { %v2163_v1 = vpop.permute.xlu1 %2162 }
 0x298   : > { %v2168_v21 = vsel %vm659_vm5, %v2161_v60, %v2163_v1 }
 0x29b   : > { %v2007_v3 = vpop.permute.xlu1 %2006 }
 0x29c   : > { %v2011_v4 = vsel %vm499_vm3, %v2005_v63, %v2007_v3 }
 0x29d   : > { %2049 = vmatprep.subr.mxu0 %v2011_v4 }
 0x29e   : > { %2050 = vmatpush1.msra.mxu0 %v2010_v6  ;;  %v2009_v7 = vpop.permute.xlu0 %2008 }
 0x29f   : > { %v2012_v8 = vsel %vm499_vm3, %v2007_v3, %v2009_v7  ;;  %v2490_v9 = vpop.permute.xlu1 %2489  ;;  %6532 = vmatmul.mubr.msk.f32.vlgmr.msra.gmra.mxu0 %vm506_vm4, %v6531_v5 }
 0x2a0   : > { %6731 = vmatpush3.msra.mxu1 %v2012_v8  ;;  %2241 = vmatprep.mubr.f32.mxu0 %v6997_v0 }
 0x2a1   : > { %6733 = vmatmul.mubr.msk.f32.vlgmr.msra.gmra.mxu1 %vm506_vm4, %v6531_v5  ;;  %6735 = vmatprep.subr.mxu1 %v6997_v0 }
 0x2a2   : > { %v2167_v10 = vpop.permute.xlu0 %2166  ;;  %6737 = vmatprep.mubr.msk.f32.mxu1 %vm7017_vm2, %v6997_v0 }
 0x2a3   : > { %v7458_v11 = vpop.permute.xlu1 %2966 }
 0x2a6   : > { %v2323_v12 = vpop.permute.xlu0 %2322 }
 0x2a7   : > { %v2325_v13 = vpop.permute.xlu1 %2324  ;;  %v2328_v23 = vsel %vm820_vm6, %v2321_v61, %v2323_v12 }
 0x2a8   : > { %v2329_v22 = vsel %vm820_vm6, %v2323_v12, %v2325_v13 }
 0x2aa   : > { %v2486_v14 = vpop.permute.xlu0 %2485 }
 0x2ab   : > { %v2488_v15 = vpop.permute.xlu1 %2487  ;;  %v2491_v31 = vsel %vm984_vm7, %v2484_v62, %v2486_v14 }
 0x2ac   : > { %v2492_v28 = vsel %vm984_vm7, %v2486_v14, %v2488_v15  ;;  %v2493_v29 = vsel %vm984_vm7, %v2488_v15, %v2490_v9 }
 0x2ae   : > { %v2165_v16 = vpop.permute.xlu0 %2164 }
 0x2af   : > { %v2170_v18 = vsel %vm659_vm5, %v2165_v16, %v2167_v10  ;;  %v7464_v19 = vpop.permute.xlu1 %3133  ;;  %v2169_v20 = vsel %vm659_vm5, %v2163_v1, %v2165_v16 }
 0x2b0   : > { %2207 = vmatprep.subr.mxu0 %v2169_v20  ;;  %6736 = vmatpush3.msra.mxu1 %v2170_v18 }
 0x2b1   : > { %2208 = vmatpush1.msra.mxu0 %v2168_v21  ;;  %6738 = vmatmul.mubr.msk.f32.vlgmr.msra.gmra.mxu1 %vm506_vm4, %v1995_v17 }
 0x2b2   : > { %6534 = vmatmul.mubr.msk.f32.vlgmr.msra.gmra.mxu0 %vm506_vm4, %v1995_v17  ;;  %2367 = vmatprep.subr.mxu0 %v2329_v22  ;;  %v2327_v24 = vpop.permute.xlu0 %2326 }
 0x2b3   : > { %v2330_v25 = vsel %vm820_vm6, %v2325_v13, %v2327_v24  ;;  %v2806_v26 = vpop.permute.xlu1 %2805  ;;  %2368 = vmatpush1.msra.mxu0 %v2328_v23  ;;  %6740 = vmatprep.subr.mxu1 %v6997_v0 }
 0x2b4   : > { %6741 = vmatpush3.msra.mxu1 %v2330_v25  ;;  %6742 = vmatprep.mubr.msk.f32.mxu1 %vm7017_vm2, %v6997_v0 }
 0x2b5   : > { %2530 = vmatprep.subr.mxu0 %v2492_v28  ;;  %2401 = vmatprep.mubr.f32.mxu0 %v6997_v0 }
 0x2b6   : > { %6743 = vmatmul.mubr.msk.f32.vlgmr.msra.gmra.mxu1 %vm506_vm4, %v6536_v27  ;;  %6745 = vmatprep.subr.mxu1 %v6997_v0  ;;  %v2808_v30 = vpop.permute.xlu0 %2807 }
 0x2b7   : > { %6537 = vmatmul.mubr.msk.f32.vlgmr.msra.gmra.mxu0 %vm506_vm4, %v6536_v27  ;;  %6746 = vmatpush3.msra.mxu1 %v2493_v29  ;;  %v2969_v33 = vpop.permute.xlu1 %2968  ;;  %v2812_v37 = vsel %vm1305_vm8, %v2806_v26, %v2808_v30 }
 0x2b8   : > { %2531 = vmatpush1.msra.mxu0 %v2491_v31  ;;  %6747 = vmatprep.mubr.msk.f32.mxu1 %vm7017_vm2, %v6997_v0  ;;  %v2974_v44 = vsel %vm1469_vm9, %v7458_v11, %v2969_v33 }
 0x2b9   : > { %2679 = vmatprep.subr.mxu0 %v7380_v55  ;;  %6750 = vmatprep.subr.mxu1 %v6997_v0 }
 0x2ba   : > { %2564 = vmatprep.mubr.f32.mxu0 %v6997_v0  ;;  %6748 = vmatmul.mubr.msk.f32.vlgmr.msra.gmra.mxu1 %vm506_vm4, %v6539_v32  ;;  %v2804_v35 = vpop.permute.xlu0 %2803 }
 0x2bb   : > { %6751 = vmatpush3.msra.mxu1 %v7385_v58  ;;  %6540 = vmatmul.mubr.msk.f32.vlgmr.msra.gmra.mxu0 %vm506_vm4, %v6539_v32  ;;  %v3130_v38 = vpop.permute.xlu1 %3129  ;;  %v2811_v40 = vsel %vm1305_vm8, %v2804_v35, %v2806_v26  ;;  %v6554_v58 = vld [vmem:[%s7998_s4 + $0x40] sm:$0xff] }
 0x2bc   : > { %2680 = vmatpush1.msra.mxu0 %v7369_v42  ;;  %2713 = vmatprep.mubr.f32.mxu0 %v6997_v0  ;;  %v6545_v42 = vld [vmem:[%s7998_s4 + $0x28] sm:$0xff] }
 0x2bd   : > { %2850 = vmatprep.subr.mxu0 %v2812_v37  ;;  %6752 = vmatprep.mubr.msk.f32.mxu1 %vm7017_vm2, %v6997_v0 }
 0x2be   : > { %v2971_v39 = vpop.permute.xlu0 %2970  ;;  %6753 = vmatmul.mubr.msk.f32.vlgmr.msra.gmra.mxu1 %vm506_vm4, %v6542_v36  ;;  %6755 = vmatprep.subr.mxu1 %v6997_v0 }
 0x2bf   : > { %6543 = vmatmul.mubr.msk.f32.vlgmr.msra.gmra.mxu0 %vm506_vm4, %v6542_v36  ;;  %v2975_v41 = vsel %vm1469_vm9, %v2969_v33, %v2971_v39  ;;  %6757 = vmatprep.mubr.msk.f32.mxu1 %vm7017_vm2, %v6997_v0  ;;  %v3297_v46 = vpop.permute.xlu1 %3296 }
 0x2c0   : > { %2851 = vmatpush1.msra.mxu0 %v2811_v40  ;;  %2884 = vmatprep.mubr.f32.mxu0 %v6997_v0  ;;  %v6548_v0 = vld [vmem:[%s7998_s4 + $0x30] sm:$0xff] }
 0x2c1   : > { %3013 = vmatprep.subr.mxu0 %v2975_v41 }
 0x2c2   : > { %v2810_v43 = vpop.permute.xlu0 %2809 }
 0x2c3   : > { %6546 = vmatmul.mubr.msk.f32.vlgmr.msra.gmra.mxu0 %vm506_vm4, %v6545_v42  ;;  %v2813_v45 = vsel %vm1305_vm8, %v2808_v30, %v2810_v43  ;;  %v3293_v53 = vpop.permute.xlu1 %3292 }
 0x2c4   : > { %3014 = vmatpush1.msra.mxu0 %v2974_v44  ;;  %6756 = vmatpush3.msra.mxu1 %v2813_v45 }
 0x2c5   : > { %6758 = vmatmul.mubr.msk.f32.vlgmr.msra.gmra.mxu1 %vm506_vm4, %v6545_v42  ;;  %3047 = vmatprep.mubr.f32.mxu0 %v7524_v47 }
 0x2c6   : > { %v3132_v48 = vpop.permute.xlu0 %3131  ;;  %6760 = vmatprep.subr.mxu1 %v7524_v47  ;;  %6762 = vmatprep.mubr.msk.f32.mxu1 %vm7017_vm2, %v7524_v47 }
 0x2c7   : > { %6549 = vmatmul.mubr.msk.f32.vlgmr.msra.gmra.mxu0 %vm506_vm4, %v6548_v0  ;;  %v3137_v50 = vsel %vm1633_vm10, %v3130_v38, %v3132_v48  ;;  %v3138_v51 = vsel %vm1633_vm10, %v3132_v48, %v7464_v19  ;;  %v3299_v61 = vpop.permute.xlu1 %3298 }
 0x2c8   : > { %3176 = vmatprep.subr.mxu0 %v3138_v51  ;;  %3210 = vmatprep.mubr.f32.mxu0 %v7524_v47  ;;  %v3302_v1 = vsel %vm1797_vm11, %v3297_v46, %v3299_v61 }
 0x2c9   : > { %3177 = vmatpush1.msra.mxu0 %v3137_v50 }
 0x2ca   : > { %v3295_v55 = vpop.permute.xlu0 %3294 }
 0x2cb   : > { %6552 = vmatmul.mubr.msk.f32.vlgmr.msra.gmra.mxu0 %vm506_vm4, %v6551_v52  ;;  %v3300_v56 = vsel %vm1797_vm11, %v3293_v53, %v3295_v55  ;;  %v3301_v57 = vsel %vm1797_vm11, %v3295_v55, %v3297_v46 }
 0x2cc   : > { %3339 = vmatprep.subr.mxu0 %v3301_v57  ;;  %3373 = vmatprep.mubr.f32.mxu0 %v7524_v47 }
 0x2cd   : > { %3340 = vmatpush1.msra.mxu0 %v3300_v56 }
 0x2ce   : > { %v2973_v59 = vpop.permute.xlu0 %2972 }
 0x2cf   : > { %6555 = vmatmul.mubr.msk.f32.vlgmr.msra.gmra.mxu0 %vm506_vm4, %v6554_v58  ;;  %v2976_v60 = vsel %vm1469_vm9, %v2971_v39, %v2973_v59 }
 0x2d0   : > { %6761 = vmatpush3.msra.mxu1 %v2976_v60  ;;  %3563 = vmatprep.mubr.f32.mxu0 %v7524_v47 }
 0x2d1   : > { %6763 = vmatmul.mubr.msk.f32.vlgmr.msra.gmra.mxu1 %vm506_vm4, %v6548_v0  ;;  %6765 = vmatprep.subr.mxu1 %v7524_v47 }
 0x2d2   : > { %v3136_v62 = vpop.permute.xlu0 %3135  ;;  %6767 = vmatprep.mubr.msk.f32.mxu1 %vm7017_vm2, %v7524_v47 }
 0x2d3   : > { %v3139_v63 = vsel %vm1633_vm10, %v7464_v19, %v3136_v62 }
 0x2d4   : > { %6766 = vmatpush3.msra.mxu1 %v3139_v63 }
 0x2d5   : > { %6768 = vmatmul.mubr.msk.f32.vlgmr.msra.gmra.mxu1 %vm506_vm4, %v6551_v52  ;;  %6770 = vmatprep.subr.mxu1 %v7524_v47 }
 0x2d6   : > { %6771 = vmatpush3.msra.mxu1 %v3302_v1  ;;  %6772 = vmatprep.mubr.msk.f32.mxu1 %vm7017_vm2, %v7524_v47 }
 0x2d7   : > { %6775 = vmatprep.subr.mxu1 %v7524_v47 }
 0x2d9   : > { %6773 = vmatmul.mubr.msk.f32.vlgmr.msra.gmra.mxu1 %vm506_vm4, %v6554_v58 }
 0x2da   : > { %6777 = vmatprep.mubr.msk.f32.mxu1 %vm7017_vm2, %v7524_v47 }
 0x2df   : > { %v3457_v50 = vpop.permute.xlu0 %3456 }
 0x35f   : > { %v2085_v4 = vpop.f32.mrf.mxu0 }
 0x361   : > { %v2156_v2 = vpop.f32.mrf.mxu1  ;;  %v2087_v5 = vpop.f32.mrf.mxu0 }
 0x363   : > { %v6734_v3 = vpop.f32.mrf.mxu1 }
 0x371   : > { %v2314_v6 = vpop.f32.mrf.mxu1 }
 0x372   : > { %v2243_v7 = vpop.f32.mrf.mxu0  ;;  %v2315_v33 = vadd.f32 %v2314_v6, %v2156_v2 }
 0x373   : > { %v6739_v8 = vpop.f32.mrf.mxu1  ;;  %v2244_v9 = vadd.f32 %v2243_v7, %v2085_v4 }
 0x374   : > { %v2245_v10 = vpop.f32.mrf.mxu0 }
 0x375   : > { %v2246_v16 = vadd.f32 %v2245_v10, %v2087_v5 }
 0x376   : > { %v2474_v11 = vpop.f32.mrf.mxu1 }
 0x377   : > { %v2403_v12 = vpop.f32.mrf.mxu0  ;;  %v2480_v40 = vadd.f32 %v2474_v11, %v2315_v33 }
 0x378   : > { %v2478_v13 = vadd.f32 %v2403_v12, %v2244_v9  ;;  %v6744_v14 = vpop.f32.mrf.mxu1  ;;  %v4933_v12 = vld [vmem:[%s8001_s7] sm:$0xff] }
 0x379   : > { %v2405_v15 = vpop.f32.mrf.mxu0 }
 0x37a   : > { %v2637_v17 = vpop.f32.mrf.mxu1  ;;  %v2479_v22 = vadd.f32 %v2405_v15, %v2246_v16 }
 0x37b   : > { %v2566_v18 = vpop.f32.mrf.mxu0  ;;  %v2643_v45 = vadd.f32 %v2637_v17, %v2480_v40  ;;  %v3483_v17 = vpop.permute.xlu1 %3482 }
 0x37c   : > { %v2641_v19 = vadd.f32 %v2566_v18, %v2478_v13  ;;  %v6749_v20 = vpop.f32.mrf.mxu1  ;;  %v3641_v13 = vpop.permute.xlu0 %3640 }
 0x37d   : > { %v2568_v21 = vpop.f32.mrf.mxu0 }
 0x37e   : > { %v2786_v23 = vpop.f32.mrf.mxu1  ;;  %v2642_v28 = vadd.f32 %v2568_v21, %v2479_v22  ;;  %v6557_v21 = vld [vmem:[%s8000_s6 + $0x8] sm:$0xff] }
 0x37f   : > { %v2715_v24 = vpop.f32.mrf.mxu0  ;;  %v2792_v52 = vadd.f32 %v2786_v23, %v2643_v45 }
 0x380   : > { %v2790_v25 = vadd.f32 %v2715_v24, %v2641_v19  ;;  %v6754_v26 = vpop.f32.mrf.mxu1  ;;  %v3801_v14 = vpop.permute.xlu0 %3800 }
 0x381   : > { %v2717_v27 = vpop.f32.mrf.mxu0 }
 0x382   : > { %v2791_v35 = vadd.f32 %v2717_v27, %v2642_v28 }
 0x383   : > { %v2886_v29 = vpop.f32.mrf.mxu0 }
 0x384   : > { %v2961_v30 = vadd.f32 %v2886_v29, %v2790_v25 }
 0x385   : > { %v2888_v31 = vpop.f32.mrf.mxu0  ;;  %v2957_v32 = vpop.f32.mrf.mxu1 }
 0x386   : > { %v2962_v41 = vadd.f32 %v2888_v31, %v2791_v35  ;;  %v2963_v58 = vadd.f32 %v2957_v32, %v2792_v52 }
 0x387   : > { %v3049_v36 = vpop.f32.mrf.mxu0  ;;  %v6759_v37 = vpop.f32.mrf.mxu1 }
 0x388   : > { %v3124_v38 = vadd.f32 %v3049_v36, %v2961_v30  ;;  %v3475_v36 = vld [vmem:[%s8000_s6] sm:$0xff] }
 0x389   : > { %v3051_v39 = vpop.f32.mrf.mxu0 }
 0x38a   : > { %v3125_v46 = vadd.f32 %v3051_v39, %v2962_v41 }
 0x38b   : > { %v3212_v42 = vpop.f32.mrf.mxu0 }
 0x38c   : > { %v3287_v43 = vadd.f32 %v3212_v42, %v3124_v38  ;;  %v6562_v42 = vld [vmem:[%s8000_s6 + $0x10] sm:$0xff] }
 0x38d   : > { %v3214_v44 = vpop.f32.mrf.mxu0 }
 0x38e   : > { %v3288_v53 = vadd.f32 %v3214_v44, %v3125_v46 }
 0x38f   : > { %v3375_v0 = vpop.f32.mrf.mxu0 }
 0x390   : > { %v3450_v48 = vadd.f32 %v3375_v0, %v3287_v43  ;;  %v6565_v0 = vld [vmem:[%s8000_s6 + $0x18] sm:$0xff] }
 0x391   : > { %v3120_v51 = vpop.f32.mrf.mxu1  ;;  %v3377_v56 = vpop.f32.mrf.mxu0 }
 0x392   : > { %v3459_v55 = vadd.f32 %v3457_v50, %v3450_v48  ;;  %v3451_v62 = vadd.f32 %v3377_v56, %v3288_v53  ;;  %v3126_v63 = vadd.f32 %v3120_v51, %v2963_v58 }
 0x393   : > { %v6764_v57 = vpop.f32.mrf.mxu1 }
 0x394   : > { %v3462_v59 = vmax.f32 %v3459_v55, 0.0  ;;  %v3460_v4 = vadd.f32 %v3457_v50, %v3451_v62  ;;  %v6568_v55 = vld [vmem:[%s8000_s6 + $0x20] sm:$0xff] }
 0x395   : > { %v3283_v60 = vpop.f32.mrf.mxu1 }
 0x396   : > { %v7564_v61 = vmul.f32 %v3462_v59, %v7366_v34  ;;  %v3289_v2 = vadd.f32 %v3283_v60, %v3126_v63  ;;  %v3463_v8 = vmax.f32 %v3460_v4, 0.0  ;;  %v6574_v4 = vld [vmem:[%s8000_s6 + $0x30] sm:$0xff] }
 0x397   : > { %v6769_v1 = vpop.f32.mrf.mxu1 }
 0x398   : > { %3642 = vrot.lane.b32.xlu0 %v7564_v61, %s7001_s18  ;;  %v7576_v11 = vmul.f32 %v3463_v8, %v7373_v49  ;;  %v6577_v8 = vld [vmem:[%s8000_s6 + $0x38] sm:$0xff] }
 0x399   : > { %v3446_v3 = vpop.f32.mrf.mxu1 }
 0x39a   : > { %v3452_v5 = vadd.f32 %v3446_v3, %v3289_v2 }
 0x39b   : > { %v6774_v6 = vpop.f32.mrf.mxu1 }
 0x39c   : > { %v3461_v7 = vadd.f32 %v3457_v50, %v3452_v5  ;;  %3802 = vrot.lane.b32.xlu0 %v7564_v61, %s7015_s27 }
 0x39e   : > { %v3464_v9 = vmax.f32 %v3461_v7, 0.0 }
 0x3a0   : > { %v7571_v10 = vmul.f32 %v3464_v9, %v7377_v54  ;;  %3965 = vrot.lane.b32.xlu0 %v7564_v61, %s7016_s28 }
 0x3a2   : > { %3488 = vrot.lane.b32.xlu1 %v7571_v10, %s7014_s26 }
 0x3a4   : > { %3486 = vrot.lane.b32.xlu0 %v7576_v11, %s7014_s26 }
 0x3a6   : > { %3646 = vrot.lane.b32.xlu1 %v7571_v10, %s7001_s18 }
 0x3a8   : > { %3963 = vrot.lane.b32.xlu0 %v7524_v47, %s7016_s28 }
 0x3aa   : > { %3484 = vrot.lane.b32.xlu1 %v7564_v61, %s7014_s26 }
 0x3ac   : > { %3969 = vrot.lane.b32.xlu0 %v7571_v10, %s7016_s28 }
 0x3ae   : > { %3806 = vrot.lane.b32.xlu1 %v7571_v10, %s7015_s27 }
 0x3b0   : > { %4287 = vrot.lane.b32.xlu0 %v7571_v10, %s7018_s29 }
 0x3b2   : > { %4283 = vrot.lane.b32.xlu1 %v7564_v61, %s7018_s29 }
 0x3b4   : > { %4446 = vrot.lane.b32.xlu0 %v7564_v61, %s7019_s30 }
 0x3b6   : > { %4450 = vrot.lane.b32.xlu1 %v7571_v10, %s7019_s30 }
 0x3b8   : > { %4609 = vrot.lane.b32.xlu0 %v7564_v61, %s8007_s11 }
 0x3ba   : > { %3644 = vrot.lane.b32.xlu1 %v7576_v11, %s7001_s18 }
 0x3bc   : > { %4448 = vrot.lane.b32.xlu0 %v7576_v11, %s7019_s30 }
 0x3be   : > { %3804 = vrot.lane.b32.xlu1 %v7576_v11, %s7015_s27 }
 0x3c0   : > { %4611 = vrot.lane.b32.xlu0 %v7576_v11, %s8007_s11 }
 0x3c2   : > { %3967 = vrot.lane.b32.xlu1 %v7576_v11, %s7016_s28 }
 0x3c4   : > { %4774 = vrot.lane.b32.xlu0 %v7576_v11, %s8011_s12 }
 0x3c6   : > { %4289 = vrot.lane.b32.xlu1 %v7524_v47, %s7018_s29 }
 0x3c8   : > { %4772 = vrot.lane.b32.xlu0 %v7564_v61, %s8011_s12 }
 0x3ca   : > { %4285 = vrot.lane.b32.xlu1 %v7576_v11, %s7018_s29 }
 0x3cc   : > { %4778 = vrot.lane.b32.xlu0 %v7524_v47, %s8011_s12 }
 0x3ce   : > { %4613 = vrot.lane.b32.xlu1 %v7571_v10, %s8007_s11 }
 0x3d0   : > { %4962 = vrot.lane.b32.xlu0 %v7524_v47, %s7014_s26 }
 0x3d2   : > { %4452 = vrot.lane.b32.xlu1 %v7524_v47, %s7019_s30 }
 0x3d4   : > { %5120 = vrot.lane.b32.xlu0 %v7524_v47, %s7001_s18 }
 0x3d6   : > { %4776 = vrot.lane.b32.xlu1 %v7571_v10, %s8011_s12 }
 0x3d8   : > { %5280 = vrot.lane.b32.xlu0 %v7524_v47, %s7015_s27 }
 0x3da   : > { %4615 = vrot.lane.b32.xlu1 %v7524_v47, %s8007_s11  ;;  %s8012_s11 = smov 110  }
 0x3dc   : > { %5443 = vrot.lane.b32.xlu0 %v7524_v47, %s7016_s28 }
 0x3de   : > { %4936 = vperm.xlu1 %6933, %v4933_v12   ;;  %v6580_v12 = vld [vmem:[%s8000_s6 + $0x40] sm:$0xff] }
 0x3e2   : > { %5769 = vrot.lane.b32.xlu1 %v7524_v47, %s7018_s29 }
 0x40a   : > { %v3643_v15 = vpop.permute.xlu0 %3642 }
 0x40b   : > { %v3648_v39 = vsel %vm659_vm5, %v3641_v13, %v3643_v15 }
 0x40e   : > { %v3803_v16 = vpop.permute.xlu0 %3802 }
 0x40f   : > { %v3808_v45 = vsel %vm820_vm6, %v3801_v14, %v3803_v16 }
 0x412   : > { %v3966_v18 = vpop.permute.xlu0 %3965 }
 0x414   : > { %v3489_v19 = vpop.permute.xlu1 %3488 }
 0x416   : > { %v3487_v20 = vpop.permute.xlu0 %3486 }
 0x417   : > { %v3492_v22 = vsel %vm499_vm3, %v3487_v20, %v3489_v19 }
 0x418   : > { %6776 = vmatpush3.msra.mxu1 %v3492_v22  ;;  %v3647_v23 = vpop.permute.xlu1 %3646 }
 0x419   : > { %6778 = vmatmul.mubr.msk.f32.vlgmr.msra.gmra.mxu1 %vm506_vm4, %v6557_v21  ;;  %6780 = vmatprep.subr.mxu1 %v7524_v47 }
 0x41a   : > { %v3964_v24 = vpop.permute.xlu0 %3963  ;;  %6782 = vmatprep.mubr.msk.f32.mxu1 %vm7017_vm2, %v7524_v47 }
 0x41b   : > { %v3971_v52 = vsel %vm984_vm7, %v3964_v24, %v3966_v18 }
 0x41c   : > { %v3485_v25 = vpop.permute.xlu1 %3484 }
 0x41d   : > { %v3490_v26 = vsel %vm499_vm3, %v3483_v17, %v3485_v25  ;;  %v3491_v27 = vsel %vm499_vm3, %v3485_v25, %v3487_v20 }
 0x41e   : > { %v3970_v28 = vpop.permute.xlu0 %3969  ;;  %3529 = vmatprep.subr.mxu0 %v3491_v27 }
 0x41f   : > { %3530 = vmatpush1.msra.mxu0 %v3490_v26 }
 0x420   : > { %v3807_v29 = vpop.permute.xlu1 %3806  ;;  %6558 = vmatmul.mubr.msk.f32.vlgmr.msra.gmra.mxu0 %vm506_vm4, %v6557_v21 }
 0x421   : > { %3721 = vmatprep.mubr.f32.mxu0 %v7524_v47 }
 0x422   : > { %v4288_v30 = vpop.permute.xlu0 %4287 }
 0x424   : > { %v4284_v31 = vpop.permute.xlu1 %4283 }
 0x426   : > { %v7657_v33 = vpop.permute.xlu0 %4446 }
 0x428   : > { %v7655_v32 = vpop.permute.xlu1 %4450 }
 0x42a   : > { %v7665_v40 = vpop.permute.xlu0 %4609 }
 0x42c   : > { %v3645_v35 = vpop.permute.xlu1 %3644 }
 0x42d   : > { %v3650_v37 = vsel %vm659_vm5, %v3645_v35, %v3647_v23  ;;  %v3649_v38 = vsel %vm659_vm5, %v3643_v15, %v3645_v35 }
 0x42e   : > { %3687 = vmatprep.subr.mxu0 %v3649_v38  ;;  %6781 = vmatpush3.msra.mxu1 %v3650_v37  ;;  %v4449_v48 = vpop.permute.xlu0 %4448 }
 0x42f   : > { %3688 = vmatpush1.msra.mxu0 %v3648_v39  ;;  %6783 = vmatmul.mubr.msk.f32.vlgmr.msra.gmra.mxu1 %vm506_vm4, %v3475_v36  ;;  %v4455_v63 = vsel %vm1469_vm9, %v4449_v48, %v7655_v32  ;;  %v4454_v1 = vsel %vm1469_vm9, %v7657_v33, %v4449_v48 }
 0x430   : > { %v3805_v41 = vpop.permute.xlu1 %3804  ;;  %6560 = vmatmul.mubr.msk.f32.vlgmr.msra.gmra.mxu0 %vm506_vm4, %v3475_v36  ;;  %6785 = vmatprep.subr.mxu1 %v7524_v47 }
 0x431   : > { %v3810_v43 = vsel %vm820_vm6, %v3805_v41, %v3807_v29  ;;  %v3809_v44 = vsel %vm820_vm6, %v3803_v16, %v3805_v41  ;;  %6787 = vmatprep.mubr.msk.f32.mxu1 %vm7017_vm2, %v7524_v47  ;;  %3881 = vmatprep.mubr.f32.mxu0 %v7524_v47 }
 0x432   : > { %3847 = vmatprep.subr.mxu0 %v3809_v44  ;;  %6786 = vmatpush3.msra.mxu1 %v3810_v43  ;;  %v4612_v57 = vpop.permute.xlu0 %4611 }
 0x433   : > { %3848 = vmatpush1.msra.mxu0 %v3808_v45  ;;  %6788 = vmatmul.mubr.msk.f32.vlgmr.msra.gmra.mxu1 %vm506_vm4, %v6562_v42  ;;  %v4617_v5 = vsel %vm1633_vm10, %v7665_v40, %v4612_v57 }
 0x434   : > { %v3968_v46 = vpop.permute.xlu1 %3967  ;;  %6563 = vmatmul.mubr.msk.f32.vlgmr.msra.gmra.mxu0 %vm506_vm4, %v6562_v42  ;;  %6790 = vmatprep.subr.mxu1 %v7524_v47 }
 0x435   : > { %v3973_v50 = vsel %vm984_vm7, %v3968_v46, %v3970_v28  ;;  %v3972_v51 = vsel %vm984_vm7, %v3966_v18, %v3968_v46  ;;  %6792 = vmatprep.mubr.msk.f32.mxu1 %vm7017_vm2, %v7524_v47  ;;  %4044 = vmatprep.mubr.f32.mxu0 %v7524_v47 }
 0x436   : > { %4010 = vmatprep.subr.mxu0 %v3972_v51  ;;  %6791 = vmatpush3.msra.mxu1 %v3973_v50  ;;  %v4775_v2 = vpop.permute.xlu0 %4774 }
 0x437   : > { %4011 = vmatpush1.msra.mxu0 %v3971_v52  ;;  %6793 = vmatmul.mubr.msk.f32.vlgmr.msra.gmra.mxu1 %vm506_vm4, %v6565_v0 }
 0x438   : > { %6795 = vmatprep.subr.mxu1 %v7524_v47  ;;  %v4290_v53 = vpop.permute.xlu1 %4289  ;;  %6566 = vmatmul.mubr.msk.f32.vlgmr.msra.gmra.mxu0 %vm506_vm4, %v6565_v0 }
 0x439   : > { %4159 = vmatprep.subr.mxu0 %v7576_v11  ;;  %6796 = vmatpush3.msra.mxu1 %v7571_v10  ;;  %v4293_v56 = vsel %vm1305_vm8, %v4288_v30, %v4290_v53 }
 0x43a   : > { %4160 = vmatpush1.msra.mxu0 %v7564_v61  ;;  %6797 = vmatprep.mubr.msk.f32.mxu1 %vm7017_vm2, %v7524_v47  ;;  %v6571_v61 = vld [vmem:[%s8000_s6 + $0x28] sm:$0xff]  ;;  %v4773_v9 = vpop.permute.xlu0 %4772 }
 0x43b   : > { %6800 = vmatprep.subr.mxu1 %v7524_v47  ;;  %4193 = vmatprep.mubr.f32.mxu0 %v7524_v47  ;;  %v4780_v13 = vsel %vm1797_vm11, %v4773_v9, %v4775_v2 }
 0x43c   : > { %6798 = vmatmul.mubr.msk.f32.vlgmr.msra.gmra.mxu1 %vm506_vm4, %v6568_v55  ;;  %v4286_v58 = vpop.permute.xlu1 %4285  ;;  %6569 = vmatmul.mubr.msk.f32.vlgmr.msra.gmra.mxu0 %vm506_vm4, %v6568_v55 }
 0x43d   : > { %6801 = vmatpush3.msra.mxu1 %v4293_v56  ;;  %v4291_v59 = vsel %vm1305_vm8, %v4284_v31, %v4286_v58  ;;  %v4292_v60 = vsel %vm1305_vm8, %v4286_v58, %v4288_v30  ;;  %6802 = vmatprep.mubr.msk.f32.mxu1 %vm7017_vm2, %v7524_v47 }
 0x43e   : > { %4330 = vmatprep.subr.mxu0 %v4292_v60  ;;  %4364 = vmatprep.mubr.f32.mxu0 %v7524_v47  ;;  %v4779_v14 = vpop.permute.xlu0 %4778 }
 0x43f   : > { %4331 = vmatpush1.msra.mxu0 %v4291_v59  ;;  %6805 = vmatprep.subr.mxu1 %v7524_v47 }
 0x440   : > { %6803 = vmatmul.mubr.msk.f32.vlgmr.msra.gmra.mxu1 %vm506_vm4, %v6571_v61  ;;  %v4614_v62 = vpop.permute.xlu1 %4613  ;;  %6572 = vmatmul.mubr.msk.f32.vlgmr.msra.gmra.mxu0 %vm506_vm4, %v6571_v61 }
 0x441   : > { %4493 = vmatprep.subr.mxu0 %v4455_v63  ;;  %v4618_v3 = vsel %vm1633_vm10, %v4612_v57, %v4614_v62  ;;  %4527 = vmatprep.mubr.f32.mxu0 %v7524_v47 }
 0x442   : > { %4494 = vmatpush1.msra.mxu0 %v4454_v1  ;;  %6807 = vmatprep.mubr.msk.f32.mxu1 %vm7017_vm2, %v7524_v47 }
 0x443   : > { %4656 = vmatprep.subr.mxu0 %v4618_v3 }
 0x444   : > { %v4453_v6 = vpop.permute.xlu1 %4452  ;;  %6575 = vmatmul.mubr.msk.f32.vlgmr.msra.gmra.mxu0 %vm506_vm4, %v6574_v4 }
 0x445   : > { %v4456_v7 = vsel %vm1469_vm9, %v7655_v32, %v4453_v6  ;;  %4657 = vmatpush1.msra.mxu0 %v4617_v5  ;;  %4690 = vmatprep.mubr.f32.mxu0 %v7524_v47 }
 0x446   : > { %6806 = vmatpush3.msra.mxu1 %v4456_v7 }
 0x447   : > { %6808 = vmatmul.mubr.msk.f32.vlgmr.msra.gmra.mxu1 %vm506_vm4, %v6574_v4  ;;  %6810 = vmatprep.subr.mxu1 %v7524_v47 }
 0x448   : > { %v4777_v10 = vpop.permute.xlu1 %4776  ;;  %6578 = vmatmul.mubr.msk.f32.vlgmr.msra.gmra.mxu0 %vm506_vm4, %v6577_v8  ;;  %6812 = vmatprep.mubr.msk.f32.mxu1 %vm7017_vm2, %v7524_v47 }
 0x449   : > { %v4781_v11 = vsel %vm1797_vm11, %v4775_v2, %v4777_v10  ;;  %4853 = vmatprep.mubr.f32.mxu0 %v7524_v47  ;;  %v4782_v17 = vsel %vm1797_vm11, %v4777_v10, %v4779_v14 }
 0x44a   : > { %4819 = vmatprep.subr.mxu0 %v4781_v11 }
 0x44b   : > { %4820 = vmatpush1.msra.mxu0 %v4780_v13 }
 0x44c   : > { %v4616_v15 = vpop.permute.xlu1 %4615  ;;  %6581 = vmatmul.mubr.msk.f32.vlgmr.msra.gmra.mxu0 %vm506_vm4, %v6580_v12 }
 0x44d   : > { %v4619_v16 = vsel %vm1633_vm10, %v4614_v62, %v4616_v15  ;;  %5043 = vmatprep.mubr.f32.mxu0 %v7524_v47 }
 0x44e   : > { %6811 = vmatpush3.msra.mxu1 %v4619_v16 }
 0x44f   : > { %6813 = vmatmul.mubr.msk.f32.vlgmr.msra.gmra.mxu1 %vm506_vm4, %v6577_v8  ;;  %6815 = vmatprep.subr.mxu1 %v7524_v47 }
 0x450   : > { %6816 = vmatpush3.msra.mxu1 %v4782_v17  ;;  %6817 = vmatprep.mubr.msk.f32.mxu1 %vm7017_vm2, %v7524_v47 }
 0x451   : > { %6820 = vmatprep.subr.mxu1 %v7524_v47 }
 0x453   : > { %6818 = vmatmul.mubr.msk.f32.vlgmr.msra.gmra.mxu1 %vm506_vm4, %v6580_v12 }
 0x454   : > { %6822 = vmatprep.mubr.msk.f32.mxu1 %vm7017_vm2, %v7524_v47 }
 0x459   : > { %v4937_v6 = vpop.permute.xlu1 %4936 }
 0x4d9   : > { %v3636_v18 = vpop.f32.mrf.mxu1 }
 0x4db   : > { %v6779_v19 = vpop.f32.mrf.mxu1 }
 0x4e0   : > { %v3565_v20 = vpop.f32.mrf.mxu0 }
 0x4e2   : > { %v3567_v21 = vpop.f32.mrf.mxu0 }
 0x4ef   : > { %v3794_v22 = vpop.f32.mrf.mxu1 }
 0x4f0   : > { %v3723_v23 = vpop.f32.mrf.mxu0  ;;  %v3795_v51 = vadd.f32 %v3794_v22, %v3636_v18 }
 0x4f1   : > { %v3724_v24 = vadd.f32 %v3723_v23, %v3565_v20  ;;  %v6784_v25 = vpop.f32.mrf.mxu1 }
 0x4f2   : > { %v3725_v26 = vpop.f32.mrf.mxu0 }
 0x4f3   : > { %v3954_v27 = vpop.f32.mrf.mxu1  ;;  %v3726_v29 = vadd.f32 %v3725_v26, %v3567_v21 }
 0x4f4   : > { %v3883_v28 = vpop.f32.mrf.mxu0  ;;  %v3960_v58 = vadd.f32 %v3954_v27, %v3795_v51  ;;  %v4955_v51 = vld [vmem:[%s8002_s8] sm:$0xff] }
 0x4f5   : > { %v3958_v30 = vadd.f32 %v3883_v28, %v3724_v24  ;;  %v6789_v31 = vpop.f32.mrf.mxu1 }
 0x4f6   : > { %v3885_v32 = vpop.f32.mrf.mxu0  ;;  %v7830_v31 = vpop.permute.xlu1 %5769 }
 0x4f7   : > { %v4117_v33 = vpop.f32.mrf.mxu1  ;;  %v3959_v36 = vadd.f32 %v3885_v32, %v3726_v29 }
 0x4f8   : > { %v4046_v35 = vpop.f32.mrf.mxu0  ;;  %v4123_v2 = vadd.f32 %v4117_v33, %v3960_v58  ;;  %v6588_v58 = vld [vmem:[%s8002_s8 + $0x10] sm:$0xff] }
 0x4f9   : > { %v4121_v37 = vadd.f32 %v4046_v35, %v3958_v30  ;;  %v6794_v38 = vpop.f32.mrf.mxu1 }
 0x4fa   : > { %v4048_v39 = vpop.f32.mrf.mxu0 }
 0x4fb   : > { %v4122_v42 = vadd.f32 %v4048_v39, %v3959_v36 }
 0x4fc   : > { %v4266_v40 = vpop.f32.mrf.mxu1  ;;  %v4195_v41 = vpop.f32.mrf.mxu0 }
 0x4fd   : > { %v4270_v43 = vadd.f32 %v4195_v41, %v4121_v37  ;;  %v4272_v4 = vadd.f32 %v4266_v40, %v4123_v2 }
 0x4fe   : > { %v6799_v44 = vpop.f32.mrf.mxu1  ;;  %v4197_v45 = vpop.f32.mrf.mxu0 }
 0x4ff   : > { %v4271_v48 = vadd.f32 %v4197_v45, %v4122_v42  ;;  %v6583_v44 = vld [vmem:[%s8002_s8 + $0x8] sm:$0xff] }
 0x500   : > { %v4437_v46 = vpop.f32.mrf.mxu1  ;;  %v4366_v0 = vpop.f32.mrf.mxu0 }
 0x501   : > { %v4441_v50 = vadd.f32 %v4366_v0, %v4270_v43  ;;  %v4443_v9 = vadd.f32 %v4437_v46, %v4272_v4 }
 0x502   : > { %v4368_v52 = vpop.f32.mrf.mxu0  ;;  %v6804_v53 = vpop.f32.mrf.mxu1 }
 0x503   : > { %v4442_v56 = vadd.f32 %v4368_v52, %v4271_v48 }
 0x504   : > { %v4529_v55 = vpop.f32.mrf.mxu0 }
 0x505   : > { %v4604_v57 = vadd.f32 %v4529_v55, %v4441_v50 }
 0x506   : > { %v4531_v59 = vpop.f32.mrf.mxu0 }
 0x507   : > { %v4600_v60 = vpop.f32.mrf.mxu1  ;;  %v4605_v62 = vadd.f32 %v4531_v59, %v4442_v56 }
 0x508   : > { %v4692_v61 = vpop.f32.mrf.mxu0  ;;  %v4606_v14 = vadd.f32 %v4600_v60, %v4443_v9 }
 0x509   : > { %v4767_v63 = vadd.f32 %v4692_v61, %v4604_v57  ;;  %v6809_v1 = vpop.f32.mrf.mxu1 }
 0x50a   : > { %v4694_v3 = vpop.f32.mrf.mxu0 }
 0x50b   : > { %v4768_v7 = vadd.f32 %v4694_v3, %v4605_v62 }
 0x50c   : > { %v4855_v5 = vpop.f32.mrf.mxu0 }
 0x50d   : > { %v4930_v8 = vadd.f32 %v4855_v5, %v4767_v63  ;;  %v6591_v63 = vld [vmem:[%s8002_s8 + $0x18] sm:$0xff] }
 0x50e   : > { %v4857_v10 = vpop.f32.mrf.mxu0 }
 0x50f   : > { %v4939_v11 = vadd.f32 %v4937_v6, %v4930_v8  ;;  %v4931_v12 = vadd.f32 %v4857_v10, %v4768_v7  ;;  %v4763_v13 = vpop.f32.mrf.mxu1 }
 0x510   : > { %v4769_v18 = vadd.f32 %v4763_v13, %v4606_v14 }
 0x511   : > { %v4942_v15 = vmax.f32 %v4939_v11, 0.0  ;;  %v4940_v16 = vadd.f32 %v4937_v6, %v4931_v12  ;;  %v6814_v17 = vpop.f32.mrf.mxu1  ;;  %v6597_v12 = vld [vmem:[%s8002_s8 + $0x28] sm:$0xff] }
 0x513   : > { %v7762_v19 = vmul.f32 %v4942_v15, %v7366_v34  ;;  %v4943_v20 = vmax.f32 %v4940_v16, 0.0  ;;  %v4926_v21 = vpop.f32.mrf.mxu1 }
 0x514   : > { %v4932_v22 = vadd.f32 %v4926_v21, %v4769_v18 }
 0x515   : > { %4948 = vst [vmem:[#allocation2 + $0x8] sm:$0xff] %v7762_v19  ;;  %v7766_v23 = vmul.f32 %v4943_v20, %v7373_v49  ;;  %v6819_v24 = vpop.f32.mrf.mxu1  ;;  %4964 = vrot.lane.b32.xlu0 %v7762_v19, %s7014_s26  ;;  %v6413_v49 = vld [vmem:[%s8003_s9] sm:$0xff] }
 0x516   : > { %v4941_v25 = vadd.f32 %v4937_v6, %v4932_v22  ;;  %v6594_v6 = vld [vmem:[%s8002_s8 + $0x20] sm:$0xff] }
 0x517   : > { %4949 = vst [vmem:[#allocation2 + $0x10] sm:$0xff] %v7766_v23 }
 0x518   : > { %v4944_v26 = vmax.f32 %v4941_v25, 0.0 }
 0x519   : > { %5122 = vrot.lane.b32.xlu0 %v7762_v19, %s7001_s18 }
 0x51a   : > { %v7774_v34 = vmul.f32 %v4944_v26, %v7377_v54  ;;  %v4963_v54 = vpop.permute.xlu0 %4962 }
 0x51c   : > { %4950 = vst [vmem:[#allocation2 + $0x18] sm:$0xff] %v7774_v34  ;;  %4968 = vrot.lane.b32.xlu1 %v7774_v34, %s7014_s26 }
 0x51d   : > { %5282 = vrot.lane.b32.xlu0 %v7762_v19, %s7015_s27 }
 0x51e   : > { %v5121_v27 = vpop.permute.xlu0 %5120 }
 0x520   : > { %5126 = vrot.lane.b32.xlu1 %v7774_v34, %s7001_s18 }
 0x521   : > { %5445 = vrot.lane.b32.xlu0 %v7762_v19, %s7016_s28 }
 0x522   : > { %v5281_v28 = vpop.permute.xlu0 %5280 }
 0x524   : > { %5286 = vrot.lane.b32.xlu1 %v7774_v34, %s7015_s27 }
 0x525   : > { %5763 = vrot.lane.b32.xlu0 %v7762_v19, %s7018_s29 }
 0x526   : > { %v5444_v29 = vpop.permute.xlu0 %5443 }
 0x528   : > { %5449 = vrot.lane.b32.xlu1 %v7774_v34, %s7016_s28 }
 0x529   : > { %5926 = vrot.lane.b32.xlu0 %v7762_v19, %s7019_s30 }
 0x52c   : > { %5767 = vrot.lane.b32.xlu1 %v7774_v34, %s7018_s29 }
 0x52d   : > { %6089 = vrot.lane.b32.xlu0 %v7762_v19, %s8012_s11 }
 0x530   : > { %4966 = vrot.lane.b32.xlu1 %v7766_v23, %s7014_s26 }
 0x531   : > { %5765 = vrot.lane.b32.xlu0 %v7766_v23, %s7018_s29 }
 0x534   : > { %5124 = vrot.lane.b32.xlu1 %v7766_v23, %s7001_s18  ;;  %s6866_s18 = smul.u32 384, %s7100_s17  ;;  %s6426_s17 = scalar_lea.sflag [#allocation4], %s350_s20 }
 0x535   : > { %5928 = vrot.lane.b32.xlu0 %v7766_v23, %s7019_s30 }
 0x538   : > { %5284 = vrot.lane.b32.xlu1 %v7766_v23, %s7015_s27 }
 0x539   : > { %6091 = vrot.lane.b32.xlu0 %v7766_v23, %s8012_s11 }
 0x53c   : > { %5447 = vrot.lane.b32.xlu1 %v7766_v23, %s7016_s28 }
 0x53d   : > { %6254 = vrot.lane.b32.xlu0 %v7766_v23, %s8011_s12 }
 0x540   : > { %5930 = vrot.lane.b32.xlu1 %v7774_v34, %s7019_s30 }
 0x541   : > { %6252 = vrot.lane.b32.xlu0 %v7762_v19, %s8011_s12 }
 0x544   : > { %5932 = vrot.lane.b32.xlu1 %v7524_v47, %s7019_s30  ;;  %s7957_s30 = scalar_lea.hbm %s8004_s10, %s6866_s18 }
 0x545   : > { %6416 = vperm.xlu0 %6932, %v6413_v49   ;;  %v6606_v49 = vld [vmem:[%s8002_s8 + $0x40] sm:$0xff] }
 0x548   : > { %6093 = vrot.lane.b32.xlu1 %v7774_v34, %s8012_s11 }
 0x54c   : > { %6095 = vrot.lane.b32.xlu1 %v7524_v47, %s8012_s11  ;;  %s6865_s11 = smul.u32 24, %s350_s20 }
 0x54e   : > { %s352_s26 = scalar_lea.vmem [#allocation3], %s6865_s11  ;;  %s6941_s11 = scalar_lea.vmem %s6940_s25, 768 }
 0x54f   : > { %s6440_s27 = sshll.u32 %s352_s26, 4  ;;  %s6441_s27 = int_to_ptr.vmem [resolvable:$true] %s6440_s27 }
 0x550   : > { %6256 = vrot.lane.b32.xlu1 %v7774_v34, %s8011_s12  ;;  %p6942_p0 = scmp.lt.s32.totalorder %s6441_s27, %s6940_s25 }
 0x554   : > { %6258 = vrot.lane.b32.xlu1 %v7524_v47, %s8011_s12  ;;  %s6935_s12 = scalar_lea.vmem %s6441_s27, 384 }
 0x555   : > { %p6936_p11 = scmp.ne.s32.totalorder %s6441_s27, %s6935_s12  ;;  %p6943_p1 = scmp.lt.s32.totalorder %s6941_s11, %s6935_s12 }
 0x557   : > { %p6937_p12 = pnand %p6936_p11, %p7117_p5  ;;  %p6944_p2 = por %p6943_p1, %p6942_p0 }
 0x559   : > { %p6938_p13 = pneg %p6937_p12 }
 0x55b   : > { %p6945_p3 = pnand %p6944_p2, %p6938_p13 }
 0x587   : > { %v4965_v30 = vpop.permute.xlu0 %4964 }
 0x588   : > { %v4970_v48 = vsel %vm499_vm3, %v4963_v54, %v4965_v30 }
 0x58b   : > { %v5123_v32 = vpop.permute.xlu0 %5122 }
 0x58c   : > { %v5128_v55 = vsel %vm659_vm5, %v5121_v27, %v5123_v32 }
 0x58e   : > { %v4969_v33 = vpop.permute.xlu1 %4968 }
 0x58f   : > { %v5283_v35 = vpop.permute.xlu0 %5282 }
 0x590   : > { %v5288_v61 = vsel %vm820_vm6, %v5281_v28, %v5283_v35 }
 0x592   : > { %v5127_v36 = vpop.permute.xlu1 %5126 }
 0x593   : > { %v5446_v37 = vpop.permute.xlu0 %5445 }
 0x594   : > { %v5451_v4 = vsel %vm984_vm7, %v5444_v29, %v5446_v37 }
 0x596   : > { %v5287_v38 = vpop.permute.xlu1 %5286 }
 0x597   : > { %v7832_v39 = vpop.permute.xlu0 %5763 }
 0x59a   : > { %v5450_v40 = vpop.permute.xlu1 %5449 }
 0x59b   : > { %v7834_v41 = vpop.permute.xlu0 %5926 }
 0x59e   : > { %v7836_v42 = vpop.permute.xlu1 %5767 }
 0x59f   : > { %v7841_v45 = vpop.permute.xlu0 %6089  ;;  %v5773_v9 = vsel %vm1305_vm8, %v7836_v42, %v7830_v31 }
 0x5a2   : > { %v4967_v43 = vpop.permute.xlu1 %4966 }
 0x5a3   : > { %v4972_v46 = vsel %vm499_vm3, %v4967_v43, %v4969_v33  ;;  %v4971_v0 = vsel %vm499_vm3, %v4965_v30, %v4967_v43  ;;  %v5766_v56 = vpop.permute.xlu0 %5765 }
 0x5a4   : > { %5009 = vmatprep.subr.mxu0 %v4971_v0  ;;  %6821 = vmatpush3.msra.mxu1 %v4972_v46  ;;  %v5772_v7 = vsel %vm1305_vm8, %v5766_v56, %v7836_v42  ;;  %v5771_v11 = vsel %vm1305_vm8, %v7832_v39, %v5766_v56 }
 0x5a5   : > { %5010 = vmatpush1.msra.mxu0 %v4970_v48  ;;  %6823 = vmatmul.mubr.msk.f32.vlgmr.msra.gmra.mxu1 %vm506_vm4, %v6583_v44 }
 0x5a6   : > { %v5125_v50 = vpop.permute.xlu1 %5124  ;;  %6584 = vmatmul.mubr.msk.f32.vlgmr.msra.gmra.mxu0 %vm506_vm4, %v6583_v44  ;;  %6825 = vmatprep.subr.mxu1 %v7524_v47 }
 0x5a7   : > { %v5130_v52 = vsel %vm659_vm5, %v5125_v50, %v5127_v36  ;;  %v5129_v53 = vsel %vm659_vm5, %v5123_v32, %v5125_v50  ;;  %6827 = vmatprep.mubr.msk.f32.mxu1 %vm7017_vm2, %v7524_v47  ;;  %5201 = vmatprep.mubr.f32.mxu0 %v7524_v47  ;;  %v5929_v1 = vpop.permute.xlu0 %5928 }
 0x5a8   : > { %5167 = vmatprep.subr.mxu0 %v5129_v53  ;;  %6826 = vmatpush3.msra.mxu1 %v5130_v52  ;;  %v5934_v16 = vsel %vm1469_vm9, %v7834_v41, %v5929_v1 }
 0x5a9   : > { %5168 = vmatpush1.msra.mxu0 %v5128_v55  ;;  %6828 = vmatmul.mubr.msk.f32.vlgmr.msra.gmra.mxu1 %vm506_vm4, %v4955_v51 }
 0x5aa   : > { %v5285_v57 = vpop.permute.xlu1 %5284  ;;  %6586 = vmatmul.mubr.msk.f32.vlgmr.msra.gmra.mxu0 %vm506_vm4, %v4955_v51  ;;  %6830 = vmatprep.subr.mxu1 %v7524_v47 }
 0x5ab   : > { %v5290_v59 = vsel %vm820_vm6, %v5285_v57, %v5287_v38  ;;  %v5289_v60 = vsel %vm820_vm6, %v5283_v35, %v5285_v57  ;;  %6832 = vmatprep.mubr.msk.f32.mxu1 %vm7017_vm2, %v7524_v47  ;;  %5361 = vmatprep.mubr.f32.mxu0 %v7524_v47  ;;  %v6092_v8 = vpop.permute.xlu0 %6091 }
 0x5ac   : > { %5327 = vmatprep.subr.mxu0 %v5289_v60  ;;  %6831 = vmatpush3.msra.mxu1 %v5290_v59  ;;  %v6097_v21 = vsel %vm1633_vm10, %v7841_v45, %v6092_v8 }
 0x5ad   : > { %5328 = vmatpush1.msra.mxu0 %v5288_v61  ;;  %6833 = vmatmul.mubr.msk.f32.vlgmr.msra.gmra.mxu1 %vm506_vm4, %v6588_v58 }
 0x5ae   : > { %v5448_v62 = vpop.permute.xlu1 %5447  ;;  %6589 = vmatmul.mubr.msk.f32.vlgmr.msra.gmra.mxu0 %vm506_vm4, %v6588_v58  ;;  %6835 = vmatprep.subr.mxu1 %v7524_v47 }
 0x5af   : > { %v5453_v2 = vsel %vm984_vm7, %v5448_v62, %v5450_v40  ;;  %v5452_v3 = vsel %vm984_vm7, %v5446_v37, %v5448_v62  ;;  %6837 = vmatprep.mubr.msk.f32.mxu1 %vm7017_vm2, %v7524_v47  ;;  %5524 = vmatprep.mubr.f32.mxu0 %v7524_v47  ;;  %v6255_v17 = vpop.permute.xlu0 %6254 }
 0x5b0   : > { %5490 = vmatprep.subr.mxu0 %v5452_v3  ;;  %6836 = vmatpush3.msra.mxu1 %v5453_v2 }
 0x5b1   : > { %5491 = vmatpush1.msra.mxu0 %v5451_v4  ;;  %6838 = vmatmul.mubr.msk.f32.vlgmr.msra.gmra.mxu1 %vm506_vm4, %v6591_v63 }
 0x5b2   : > { %6840 = vmatprep.subr.mxu1 %v7524_v47  ;;  %v5931_v5 = vpop.permute.xlu1 %5930  ;;  %6592 = vmatmul.mubr.msk.f32.vlgmr.msra.gmra.mxu0 %vm506_vm4, %v6591_v63 }
 0x5b3   : > { %6841 = vmatpush3.msra.mxu1 %v7774_v34  ;;  %5639 = vmatprep.subr.mxu0 %v7766_v23  ;;  %v5935_v14 = vsel %vm1469_vm9, %v5929_v1, %v5931_v5  ;;  %v6603_v23 = vld [vmem:[%s8002_s8 + $0x38] sm:$0xff]  ;;  %v6253_v24 = vpop.permute.xlu0 %6252 }
 0x5b4   : > { %5640 = vmatpush1.msra.mxu0 %v7762_v19  ;;  %6842 = vmatprep.mubr.msk.f32.mxu1 %vm7017_vm2, %v7524_v47  ;;  %v6600_v19 = vld [vmem:[%s8002_s8 + $0x30] sm:$0xff]  ;;  %v6260_v34 = vsel %vm1797_vm11, %v6253_v24, %v6255_v17 }
 0x5b5   : > { %5810 = vmatprep.subr.mxu0 %v5772_v7  ;;  %6845 = vmatprep.subr.mxu1 %v7524_v47 }
 0x5b6   : > { %5673 = vmatprep.mubr.f32.mxu0 %v7524_v47  ;;  %6843 = vmatmul.mubr.msk.f32.vlgmr.msra.gmra.mxu1 %vm506_vm4, %v6594_v6  ;;  %v5933_v10 = vpop.permute.xlu1 %5932 }
 0x5b7   : > { %6846 = vmatpush3.msra.mxu1 %v5773_v9  ;;  %6595 = vmatmul.mubr.msk.f32.vlgmr.msra.gmra.mxu0 %vm506_vm4, %v6594_v6  ;;  %v5936_v13 = vsel %vm1469_vm9, %v5931_v5, %v5933_v10 }
 0x5b8   : > { %5811 = vmatpush1.msra.mxu0 %v5771_v11  ;;  %6847 = vmatprep.mubr.msk.f32.mxu1 %vm7017_vm2, %v7524_v47 }
 0x5b9   : > { %5973 = vmatprep.subr.mxu0 %v5935_v14  ;;  %6850 = vmatprep.subr.mxu1 %v7524_v47 }
 0x5ba   : > { %5844 = vmatprep.mubr.f32.mxu0 %v7524_v47  ;;  %6848 = vmatmul.mubr.msk.f32.vlgmr.msra.gmra.mxu1 %vm506_vm4, %v6597_v12  ;;  %v6094_v15 = vpop.permute.xlu1 %6093 }
 0x5bb   : > { %6851 = vmatpush3.msra.mxu1 %v5936_v13  ;;  %6598 = vmatmul.mubr.msk.f32.vlgmr.msra.gmra.mxu0 %vm506_vm4, %v6597_v12  ;;  %v6098_v18 = vsel %vm1633_vm10, %v6092_v8, %v6094_v15 }
 0x5bc   : > { %5974 = vmatpush1.msra.mxu0 %v5934_v16  ;;  %6852 = vmatprep.mubr.msk.f32.mxu1 %vm7017_vm2, %v7524_v47 }
 0x5bd   : > { %6136 = vmatprep.subr.mxu0 %v6098_v18  ;;  %6007 = vmatprep.mubr.f32.mxu0 %v7524_v47 }
 0x5be   : > { %6853 = vmatmul.mubr.msk.f32.vlgmr.msra.gmra.mxu1 %vm506_vm4, %v6600_v19  ;;  %v6096_v20 = vpop.permute.xlu1 %6095  ;;  %6855 = vmatprep.subr.mxu1 %v7524_v47 }
 0x5bf   : > { %v6099_v22 = vsel %vm1633_vm10, %v6094_v15, %v6096_v20  ;;  %6601 = vmatmul.mubr.msk.f32.vlgmr.msra.gmra.mxu0 %vm506_vm4, %v6600_v19  ;;  %6857 = vmatprep.mubr.msk.f32.mxu1 %vm7017_vm2, %v7524_v47 }
 0x5c0   : > { %6137 = vmatpush1.msra.mxu0 %v6097_v21  ;;  %6856 = vmatpush3.msra.mxu1 %v6099_v22  ;;  %v6417_v19 = vpop.permute.xlu0 %6416 }
 0x5c1   : > { %6170 = vmatprep.mubr.f32.mxu0 %v7524_v47  ;;  %6860 = vmatprep.subr.mxu1 %v7524_v47 }
 0x5c2   : > { %6858 = vmatmul.mubr.msk.f32.vlgmr.msra.gmra.mxu1 %vm506_vm4, %v6603_v23  ;;  %v6257_v25 = vpop.permute.xlu1 %6256 }
 0x5c3   : > { %6604 = vmatmul.mubr.msk.f32.vlgmr.msra.gmra.mxu0 %vm506_vm4, %v6603_v23  ;;  %v6261_v26 = vsel %vm1797_vm11, %v6255_v17, %v6257_v25  ;;  %6862 = vmatprep.mubr.msk.f32.mxu1 %vm7017_vm2, %v7524_v47 }
 0x5c4   : > { %6299 = vmatprep.subr.mxu0 %v6261_v26  ;;  %6333 = vmatprep.mubr.f32.mxu0 %v7524_v47 }
 0x5c5   : > { %6300 = vmatpush1.msra.mxu0 %v6260_v34 }
 0x5c6   : > { %v6259_v54 = vpop.permute.xlu1 %6258 }
 0x5c7   : > { %v6262_v27 = vsel %vm1797_vm11, %v6257_v25, %v6259_v54  ;;  %6607 = vmatmul.mubr.msk.f32.vlgmr.msra.gmra.mxu0 %vm506_vm4, %v6606_v49 }
 0x5c8   : > { %6861 = vmatpush3.msra.mxu1 %v6262_v27 }
 0x5c9   : > { %6863 = vmatmul.mubr.msk.f32.vlgmr.msra.gmra.mxu1 %vm506_vm4, %v6606_v49 }
 0x665   : > { %v5116_v28 = vpop.f32.mrf.mxu1 }
 0x666   : > { %v5045_v29 = vpop.f32.mrf.mxu0 }
 0x667   : > { %v6824_v30 = vpop.f32.mrf.mxu1 }
 0x668   : > { %v5047_v31 = vpop.f32.mrf.mxu0 }
 0x669   : > { %v5274_v32 = vpop.f32.mrf.mxu1 }
 0x66a   : > { %v5203_v33 = vpop.f32.mrf.mxu0  ;;  %v5275_v52 = vadd.f32 %v5274_v32, %v5116_v28 }
 0x66b   : > { %v6829_v47 = vpop.f32.mrf.mxu1  ;;  %v5204_v48 = vadd.f32 %v5203_v33, %v5045_v29 }
 0x66c   : > { %v5205_v35 = vpop.f32.mrf.mxu0 }
 0x66d   : > { %v5434_v36 = vpop.f32.mrf.mxu1  ;;  %v5206_v53 = vadd.f32 %v5205_v35, %v5047_v31 }
 0x66e   : > { %v5363_v37 = vpop.f32.mrf.mxu0  ;;  %v5440_v58 = vadd.f32 %v5434_v36, %v5275_v52 }
 0x66f   : > { %v6834_v38 = vpop.f32.mrf.mxu1  ;;  %v5438_v55 = vadd.f32 %v5363_v37, %v5204_v48 }
 0x670   : > { %v5365_v39 = vpop.f32.mrf.mxu0 }
 0x671   : > { %v5597_v40 = vpop.f32.mrf.mxu1  ;;  %v5439_v59 = vadd.f32 %v5365_v39, %v5206_v53 }
 0x672   : > { %v5526_v41 = vpop.f32.mrf.mxu0  ;;  %v5603_v63 = vadd.f32 %v5597_v40, %v5440_v58 }
 0x673   : > { %v6839_v42 = vpop.f32.mrf.mxu1  ;;  %v5601_v60 = vadd.f32 %v5526_v41, %v5438_v55 }
 0x674   : > { %v5528_v43 = vpop.f32.mrf.mxu0 }
 0x675   : > { %v5602_v1 = vadd.f32 %v5528_v43, %v5439_v59 }
 0x676   : > { %v5746_v44 = vpop.f32.mrf.mxu1 }
 0x677   : > { %v5675_v45 = vpop.f32.mrf.mxu0  ;;  %v5752_v5 = vadd.f32 %v5746_v44, %v5603_v63 }
 0x678   : > { %v6844_v46 = vpop.f32.mrf.mxu1  ;;  %v5750_v2 = vadd.f32 %v5675_v45, %v5601_v60 }
 0x679   : > { %v5677_v0 = vpop.f32.mrf.mxu0 }
 0x67a   : > { %v5917_v50 = vpop.f32.mrf.mxu1  ;;  %v5751_v6 = vadd.f32 %v5677_v0, %v5602_v1 }
 0x67b   : > { %v5846_v51 = vpop.f32.mrf.mxu0  ;;  %v5923_v10 = vadd.f32 %v5917_v50, %v5752_v5 }
 0x67c   : > { %v6849_v56 = vpop.f32.mrf.mxu1  ;;  %v5921_v7 = vadd.f32 %v5846_v51, %v5750_v2 }
 0x67d   : > { %v5848_v57 = vpop.f32.mrf.mxu0 }
 0x67e   : > { %v6080_v61 = vpop.f32.mrf.mxu1  ;;  %v5922_v11 = vadd.f32 %v5848_v57, %v5751_v6 }
 0x67f   : > { %v6009_v62 = vpop.f32.mrf.mxu0  ;;  %v6086_v15 = vadd.f32 %v6080_v61, %v5923_v10 }
 0x680   : > { %v6854_v3 = vpop.f32.mrf.mxu1  ;;  %v6084_v12 = vadd.f32 %v6009_v62, %v5921_v7 }
 0x681   : > { %v6011_v4 = vpop.f32.mrf.mxu0 }
 0x682   : > { %v6243_v8 = vpop.f32.mrf.mxu1  ;;  %v6085_v16 = vadd.f32 %v6011_v4, %v5922_v11 }
 0x683   : > { %v6172_v9 = vpop.f32.mrf.mxu0  ;;  %v6249_v20 = vadd.f32 %v6243_v8, %v6086_v15 }
 0x684   : > { %v6859_v13 = vpop.f32.mrf.mxu1  ;;  %v6247_v17 = vadd.f32 %v6172_v9, %v6084_v12 }
 0x685   : > { %v6174_v14 = vpop.f32.mrf.mxu0 }
 0x686   : > { %v6248_v21 = vadd.f32 %v6174_v14, %v6085_v16 }
 0x687   : > { %v6335_v18 = vpop.f32.mrf.mxu0 }
 0x688   : > { %v6410_v22 = vadd.f32 %v6335_v18, %v6247_v17 }
 0x689   : > { %v6337_v23 = vpop.f32.mrf.mxu0  ;;  %v6406_v24 = vpop.f32.mrf.mxu1 }
 0x68a   : > { %v6419_v25 = vadd.f32 %v6417_v19, %v6410_v22  ;;  %v6411_v26 = vadd.f32 %v6337_v23, %v6248_v21  ;;  %v6412_v34 = vadd.f32 %v6406_v24, %v6249_v20 }
 0x68b   : > { %v6864_v49 = vpop.f32.mrf.mxu1 }
 0x68c   : > { %6422 = vst [vmem:[%s352_s26] sm:$0xff] %v6419_v25  ;;  %v6420_v54 = vadd.f32 %v6417_v19, %v6411_v26  ;;  %v6421_v27 = vadd.f32 %v6417_v19, %v6412_v34 }
 0x68e   : > { %6423 = vst [vmem:[%s352_s26 + $0x8] sm:$0xff] %v6420_v54  ;;  %6424 = vst [vmem:[%s352_s26 + $0x10] sm:$0xff] %v6421_v27 }
 0x68f   : > { %6948 = shalt.err (!%p6945_p3)
}
 0x690   : > { %s6949_s18 = scalar_lea.hbm %s7957_s30, 384  ;;  %s6953_s28 = scalar_lea.hbm %s8004_s10, 768 }
 0x691   : > { %p6950_p4 = scmp.ne.s32.totalorder %s7957_s30, %s6949_s18  ;;  %p6954_p9 = scmp.lt.s32.totalorder %s7957_s30, %s8004_s10 }
 0x692   : > { %p6955_p10 = scmp.lt.s32.totalorder %s6953_s28, %s6949_s18 }
 0x693   : > { %p6951_p7 = pnand %p6950_p4, %p7117_p5 }
 0x694   : > { %p6956_p11 = por %p6955_p10, %p6954_p9 }
 0x695   : > { %p6952_p8 = pneg %p6951_p7 }
 0x697   : > { %p6957_p12 = pnand %p6956_p11, %p6952_p8 }
 0x699   : > { %6960 = shalt.err (!%p6957_p12)
}
 0x69a   : > { %6867 = dma.vmem_to_hbm [thread:$0]  (%p7117_p5), %s6441_s27, 384, %s7957_s30, %s6426_s17  }
 0x69b PF: > { %p6873_p13 = scmp.ge.s32.totalorder %s6995_s16, 2  ;;  %s6452_s12 = sand.u32 1, %s6983_s13  }
 0x69c   : > { %s6453_s25 = scalar_lea.sflag [#allocation4], %s6452_s12 }
 0x69d   : > { %p6870_p0 = pnand %p6873_p13, %p7121_p6 }
 0x69f   : > { %p6871_p1 = pneg %p6870_p0 }
 0x6a1   : > { %6978 = dma.done.wait (%p6871_p1), %s6453_s25, 384  }
 0x6a2   : > { %6980 = vsyncadd (%p6871_p1), %s6453_s25, 4294966912  ;;  %p20_p2 = scmp.ge.s32.totalorder %s7104_s19, 4   ;;  %s8013_s13 = smov %s6987_s14 }
 0x6a3   : > { %s8014_s14 = smov %s6991_s15  ;;  %s8015_s15 = smov %s7115_s22 }
 0x6a4   : > { %s8016_s16 = smov %s7104_s19  ;;  %22 = sbr.rel (!%p20_p2) target bundleno = 3 (0x3), region = 127 }
 0x6a9   :  { %6458 = vsyncpa [#allocation4], 1 }
 0x6aa   :  { %6460 = vsyncpa [#allocation4 + $0x1], 1 }

</bundles_post_ra>
